<compile_context>
chip_gen: v6e
topology: v6e:2x2x1
jax: 0.10.0
libtpu: 0.0.40
codegen_flags: <defaults>
</compile_context>

<pallas_src>
import functools

import jax
import jax.numpy as jnp
from jax import lax
from jax.experimental import pallas as pl
from jax.experimental.pallas import tpu as pltpu


# ----------------------------- Pallas kernel -----------------------------

def _cnn_fused_kernel(a1_ref, mask_ref, w1_ref, b1_ref, w2_ref, b2_ref,
                      wz_ref, bz_ref, tz_ref, wn2_ref, b128_ref, g_ref,
                      out_ref, *, tab_lanes):
    """Fused forward for one batch tile (Bt samples flattened on rows).

    Row layout: Bt sample blocks of L = T + 4 rows each:
      rows [0,1] zero pad, [2 .. T+1] spectrogram frames, [T+2, T+3] zero pad.
    conv1 output frame t lands on row b*L + 1 + t, conv2 output frame t on row
    b*L + t; the row mask zeroes every non-valid conv1 row so the 'same' time
    padding of the second conv is exact and samples never bleed into each other.
    """
    f32 = jnp.float32
    bf16 = jnp.bfloat16
    M = mask_ref.shape[0]          # Bt * L rows in this tile
    Mf = M - 2                     # rows after the second (time) conv

    # ---- conv block 1: 3x3 'same' conv as 3 full-height MXU matmuls.
    # Time taps are pre-shifted by the wrapper (a1_ref[kw][r] = frame row r+kw)
    # so every LHS load is sublane-aligned; the frequency-axis 'same' padding is
    # folded into the band-structured shift weights w1.
    o1 = jnp.dot(a1_ref[0].astype(bf16), w1_ref[0], preferred_element_type=f32)
    o1 = o1 + jnp.dot(a1_ref[1].astype(bf16), w1_ref[1],
                      preferred_element_type=f32)
    o1 = o1 + jnp.dot(a1_ref[2].astype(bf16), w1_ref[2],
                      preferred_element_type=f32)
    o1 = jnp.maximum(o1 + b1_ref[...], 0.0) * mask_ref[...]      # (M, F*C1)

    # ---- conv block 2: time taps as static row slices of the in-VMEM o1.
    feats = jnp.dot(o1[0:Mf].astype(bf16), w2_ref[0],
                    preferred_element_type=f32)
    feats = feats + jnp.dot(o1[1:Mf + 1].astype(bf16), w2_ref[1],
                            preferred_element_type=f32)
    feats = feats + jnp.dot(o1[2:Mf + 2].astype(bf16), w2_ref[2],
                            preferred_element_type=f32)
    feats = jnp.maximum(feats + b2_ref[...], 0.0)                 # (Mf, F*C2)
    fb = feats.astype(bf16)

    # ---- per-string fc LinearBlock (1x1 conv aggregation folded in), all
    # strings stacked on lanes -> one wide matmul.
    # TODO(synk): LinearBlock norm/dropout internals unspecified; Linear+ReLU.
    z = jnp.maximum(jnp.dot(fb, wz_ref[...], preferred_element_type=f32)
                    + bz_ref[...], 0.0)                           # (Mf, S*Hd)

    # ---- combined head, lane-dense 128-wide:
    #   lanes [0, S*Cc)   : tab logits for all strings (block-diag weights)
    #   lanes [S*Cc, 128) : raw notes logits (identity block folded into wn2)
    # TODO(synk): FCStringBlock internals unspecified; per-string Linear+softmax.
    logits = (jnp.dot(z.astype(bf16), tz_ref[...], preferred_element_type=f32)
              + jnp.dot(fb, wn2_ref[...], preferred_element_type=f32)
              + b128_ref[...])                                    # (Mf, 128)

    # ---- per-string softmax over groups of Cc lanes.  The per-row global max
    # is a valid (group-constant) shift; per-group sums are broadcast back to
    # every lane of the group with one matmul against a 0/1 group matrix.
    m = jnp.max(logits, axis=-1, keepdims=True)
    e = jnp.exp(logits - m)
    den = jnp.dot(e, g_ref[...], preferred_element_type=f32)
    probs = e * pl.reciprocal(den, approx=False)

    lane = lax.broadcasted_iota(jnp.int32, logits.shape, 1)
    out_ref[0:Mf, :] = jnp.where(lane < tab_lanes, probs, logits)


# ------------------------ wrapper-side weight folding ------------------------

def _conv_shift_weights(w_hwio, F):
    """Fold a 3x3 'same' conv into 3 shift matrices (one per time tap).

    Returns W of shape (3, F*Cin, F*Cout) with
      W[kw, fi*Cin + ci, fo*Cout + co] = sum_kh w[kh, kw, ci, co] * [fi == fo+kh-1]
    so that out[r] = sum_kw A[r + kw] @ W[kw] on the lane-dense (rows, F*Cin)
    activations (frequency 'same' padding folded into the band structure).
    """
    KH, KW, Ci, Co = w_hwio.shape
    f_in = jnp.arange(F)
    f_out = jnp.arange(F)
    kh = jnp.arange(KH)
    band = (f_in[None, :, None] == f_out[None, None, :] + kh[:, None, None] - 1)
    band = band.astype(jnp.float32)                           # (KH, F, F)
    wk = jnp.einsum('kio,kqcd->qicod', band, w_hwio)          # (KW, F, Ci, F, Co)
    return wk.reshape(KW, F * Ci, F * Co)


def cnn_forward(params, x, *, batch_tile=8):
    """x: (B, Cin, H=F, W=T) NCHW, matching the PyTorch module's convention."""
    f32 = jnp.float32
    bf16 = jnp.bfloat16
    B, Cin, F, T = x.shape
    C1 = params["conv1_b"].shape[0]
    C2 = params["conv2_b"].shape[0]
    S = params["aggs_w"].shape[1]
    Hd = params["fc_w"].shape[1]
    Ln = params["notes_w"].shape[1]
    Cc = params["tab_w"].shape[-1]

    L = T + 4                               # per-sample rows: 2 pad + T + 2 pad
    NL = S * Cc + Ln                        # useful output lanes (=128 here)
    NLp = ((NL + 127) // 128) * 128         # padded lane-dense output width

    Bt = min(B, batch_tile)                 # samples per grid step
    B_pad = ((B + Bt - 1) // Bt) * Bt
    Mblk = Bt * L

    output = {"features": x}                # ConvFeatureExtractor input_features

    # ----- lane-dense, per-sample time-padded input + pre-shifted time taps
    x_td = jnp.transpose(x, (0, 3, 2, 1)).reshape(B, T, F * Cin).astype(f32)
    a1 = jnp.zeros((B_pad, L, F * Cin), f32).at[:B, 2:2 + T, :].set(x_td)
    a1 = a1.reshape(B_pad * L, F * Cin)
    pad2 = jnp.zeros((2, F * Cin), f32)
    a1_taps = jnp.stack([a1,
                         jnp.concatenate([a1[1:], pad2[:1]], axis=0),
                         jnp.concatenate([a1[2:], pad2], axis=0)], axis=0)

    # row mask: keep only valid conv1-output rows, i.e. (row mod L) in [1, T]
    r = jnp.arange(Mblk) % L
    mask = ((r >= 1) & (r <= T)).astype(f32).reshape(Mblk, 1)

    # ----- conv weights as band/shift matrices (freq 'same' padding folded in)
    w1 = _conv_shift_weights(params["conv1_w"].astype(f32), F).astype(bf16)
    b1 = jnp.tile(params["conv1_b"].astype(f32), F).reshape(1, F * C1)
    w2 = _conv_shift_weights(params["conv2_w"].astype(f32), F).astype(bf16)
    b2 = jnp.tile(params["conv2_b"].astype(f32), F).reshape(1, F * C2)

    # ----- notes head: Linear(notes_w) ∘ Conv1x1(aggn) folded into (F*C2, Ln)
    wn = (params["notes_w"][:, None, :] * params["aggn_w"][None, :, 0, None])
    wn = wn.reshape(F * C2, Ln).astype(f32)
    bn = (params["aggn_b"][0] * jnp.sum(params["notes_w"], axis=0)
          + params["notes_b"]).reshape(1, Ln).astype(f32)

    # ----- string path: LinearBlock(fc) ∘ Conv1x1(aggs), all strings on lanes
    wz = jnp.einsum('fh,cs->fcsh', params["fc_w"], params["aggs_w"])
    wz = wz.reshape(F * C2, S * Hd).astype(bf16)
    bz = (params["aggs_b"][:, None] * jnp.sum(params["fc_w"], axis=0)[None, :]
          + params["fc_b"][None, :]).reshape(1, S * Hd).astype(f32)

    # ----- tab head stacked across strings + notes passthrough (128 lanes):
    #   logits128 = z @ tz + feats @ wn2 + b128, with
    #   tz   = block-diag(tab_w[s,:Hd,:]) padded with 8 zero cols,
    #   wn2  = wn @ [tabn_blk | I_Ln]  (concat([z, notes]) split into two dots,
    #          notes identity-passthrough lands on the last 8 lanes),
    #   b128 = bn @ [tabn_blk | I_Ln] + [tab_b, 0].
    tabz = params["tab_w"][:, :Hd, :].astype(f32)               # (S, Hd, Cc)
    tabn = params["tab_w"][:, Hd:, :].astype(f32)               # (S, Ln, Cc)
    tz_blk = jnp.einsum('st,shc->shtc', jnp.eye(S, dtype=f32), tabz)
    tz_blk = tz_blk.reshape(S * Hd, S * Cc)                     # block-diagonal
    tz = jnp.zeros((S * Hd, NLp), f32).at[:, :S * Cc].set(tz_blk).astype(bf16)
    tn_blk = jnp.transpose(tabn, (1, 0, 2)).reshape(Ln, S * Cc)
    tn = (jnp.zeros((Ln, NLp), f32)
          .at[:, :S * Cc].set(tn_blk)
          .at[:, S * Cc:S * Cc + Ln].set(jnp.eye(Ln, dtype=f32)))
    wn2 = (wn @ tn).astype(bf16)                                # (F*C2, NLp)
    tabb = params["tab_b"][:, 0, :].reshape(S * Cc).astype(f32)
    b128 = bn @ tn + jnp.zeros((1, NLp), f32).at[0, :S * Cc].set(tabb)

    # softmax group matrix: 1 where two lanes belong to the same string group
    gid = jnp.concatenate([jnp.repeat(jnp.arange(S), Cc),
                           jnp.full((NLp - S * Cc,), S, jnp.int32)])
    g_mat = (gid[:, None] == gid[None, :]).astype(f32)          # (NLp, NLp)

    kernel = functools.partial(_cnn_fused_kernel, tab_lanes=S * Cc)
    const2 = lambda shp: pl.BlockSpec(shp, lambda i: (0, 0))
    const3 = lambda shp: pl.BlockSpec(shp, lambda i: (0, 0, 0))

    out = pl.pallas_call(
        kernel,
        out_shape=jax.ShapeDtypeStruct((B_pad * L, NLp), f32),
        grid=(B_pad // Bt,),
        in_specs=[
            pl.BlockSpec((3, Mblk, F * Cin), lambda i: (0, i, 0)),
            const2((Mblk, 1)),
            const3((3, F * Cin, F * C1)), const2((1, F * C1)),
            const3((3, F * C1, F * C2)), const2((1, F * C2)),
            const2((F * C2, S * Hd)), const2((1, S * Hd)),
            const2((S * Hd, NLp)), const2((F * C2, NLp)),
            const2((1, NLp)), const2((NLp, NLp)),
        ],
        out_specs=pl.BlockSpec((Mblk, NLp), lambda i: (i, 0)),
        compiler_params=pltpu.CompilerParams(dimension_semantics=("parallel",)),
    )(a1_taps, mask, w1, b1, w2, b2, wz, bz, tz, wn2, b128, g_mat)

    # drop per-sample pad rows / batch pad and split the lane-dense slab
    out = out.reshape(B_pad, L, NLp)[:B, :T, :]
    tab = out[..., :S * Cc].reshape(B, T, S, Cc).transpose(0, 2, 1, 3)
    notes = out[..., S * Cc:S * Cc + Ln]

    output["attention_map"] = None   # use_self_attention=False
    output["ffm_emb"] = None         # insert_ffm=False
    output["notes"] = notes
    output["tab"] = tab
    return output


# ------------------------------- reference / init ---------------------------

def init_params(key, *, c_in=4, conv_dims=(8, 8), num_strings=6,
                feat_dim=16, hidden=32, len_notes=8, num_classes=20):
    ks = jax.random.split(key, 14)

    def nrm(k, shape, scale=0.1):
        return (scale * jax.random.normal(k, shape)).astype(jnp.float32)

    c1, c2 = conv_dims
    return {
        # ConvFeatureExtractor: two 3x3 'same' conv+ReLU blocks (HWIO weights)
        "conv1_w": nrm(ks[0], (3, 3, c_in, c1)), "conv1_b": nrm(ks[1], (c1,)),
        "conv2_w": nrm(ks[2], (3, 3, c1, c2)),   "conv2_b": nrm(ks[3], (c2,)),
        # conv_aggregation='conv': 1x1 convs over channels
        "aggn_w": nrm(ks[4], (c2, 1)),           "aggn_b": nrm(ks[5], (1,)),
        "aggs_w": nrm(ks[6], (c2, num_strings)), "aggs_b": nrm(ks[7], (num_strings,)),
        # fc LinearBlock (F -> hidden) and output_notes head (F -> len_notes)
        "fc_w": nrm(ks[8], (feat_dim, hidden)),        "fc_b": nrm(ks[9], (hidden,)),
        "notes_w": nrm(ks[10], (feat_dim, len_notes)), "notes_b": nrm(ks[11], (len_notes,)),
        # fc_string_block_tab: per-string Linear(hidden+len_notes -> num_classes)+softmax
        "tab_w": nrm(ks[12], (num_strings, hidden + len_notes, num_classes)),
        "tab_b": nrm(ks[13], (num_strings, 1, num_classes)),
    }


def reference_forward(params, x):
    """Pure-JAX/XLA reference mirroring the PyTorch forward (validation only)."""
    f32 = jnp.float32
    B = x.shape[0]
    h = x.astype(f32)
    for wk, bk in (("conv1_w", "conv1_b"), ("conv2_w", "conv2_b")):
        h = lax.conv_general_dilated(h, params[wk].astype(f32), (1, 1), "SAME",
                                     dimension_numbers=("NCHW", "HWIO", "NCHW"))
        h = jax.nn.relu(h + params[bk][None, :, None, None])
    feats = jnp.transpose(h, (0, 1, 3, 2))                       # permute(0,1,3,2)
    f_notes = jnp.einsum("bcwh,c->bwh", feats, params["aggn_w"][:, 0]) + params["aggn_b"][0]
    f_str = (jnp.einsum("bcwh,cs->bswh", feats, params["aggs_w"])
             + params["aggs_b"][None, :, None, None])
    notes = f_notes @ params["notes_w"] + params["notes_b"]      # (B, T, Ln)
    z = jax.nn.relu(f_str @ params["fc_w"] + params["fc_b"])     # (B, S, T, Hd)
    S, T, Ln = z.shape[1], z.shape[2], notes.shape[-1]
    cat = jnp.concatenate([z, jnp.broadcast_to(notes[:, None], (B, S, T, Ln))], axis=-1)
    logits = jnp.einsum("bstd,sdc->bstc", cat, params["tab_w"]) + params["tab_b"][None]
    return notes, jax.nn.softmax(logits, axis=-1)


if __name__ == "__main__":
    key = jax.random.PRNGKey(0)
    pkey, xkey = jax.random.split(key)
    params = init_params(pkey)
    x = jax.random.normal(xkey, (2, 4, 16, 16), dtype=jnp.float32)   # (B, Cin, H, W)

    fwd = jax.jit(cnn_forward)
    out = fwd(params, x)
    jax.block_until_ready(out["tab"])
    jax.block_until_ready(out["notes"])

    # sanity checks
    assert out["notes"].shape == (2, 16, 8)
    assert out["tab"].shape == (2, 6, 16, 20)
    assert bool(jnp.all(jnp.abs(out["tab"].sum(-1) - 1.0) < 2e-3))

    # numerical check against a pure-JAX f32 reference (kernel matmuls are bf16
    # with f32 accumulation, so tolerances allow for bf16 operand rounding)
    ref_notes, ref_tab = reference_forward(params, x)
    assert bool(jnp.allclose(out["notes"], ref_notes, atol=2e-2, rtol=2e-2))
    assert bool(jnp.allclose(out["tab"], ref_tab, atol=1e-2, rtol=1e-2))

    print("KERNEL_OK")
</pallas_src>

<mosaic_0001>
module attributes {stable_mosaic.version = 11 : i64} {
  func.func @_cnn_fused_kernel(%arg0: i32, %arg1: memref<3x40x64xf32, #tpu.memory_space<vmem>>, %arg2: memref<40x1xf32, #tpu.memory_space<vmem>>, %arg3: memref<3x64x128xbf16, #tpu.memory_space<vmem>>, %arg4: memref<1x128xf32, #tpu.memory_space<vmem>>, %arg5: memref<3x128x128xbf16, #tpu.memory_space<vmem>>, %arg6: memref<1x128xf32, #tpu.memory_space<vmem>>, %arg7: memref<128x192xbf16, #tpu.memory_space<vmem>>, %arg8: memref<1x192xf32, #tpu.memory_space<vmem>>, %arg9: memref<192x128xbf16, #tpu.memory_space<vmem>>, %arg10: memref<128x128xbf16, #tpu.memory_space<vmem>>, %arg11: memref<1x128xf32, #tpu.memory_space<vmem>>, %arg12: memref<128x128xf32, #tpu.memory_space<vmem>>, %arg13: memref<40x128xf32, #tpu.memory_space<vmem>>) attributes {dimension_semantics = [#tpu.dimension_semantics<parallel>], iteration_bounds = array<i64: 1>, scalar_prefetch = 0 : i64, scratch_operands = 0 : i64, tpu.core_type = #tpu.core_type<tc>, window_params = [{transform_indices = @transform_0, window_bounds = array<i64: 3, 40, 64>}, {pipeline_mode = #tpu.pipeline_mode<synchronous>, transform_indices = @transform_1, window_bounds = array<i64: 40, 1>}, {pipeline_mode = #tpu.pipeline_mode<synchronous>, transform_indices = @transform_2, window_bounds = array<i64: 3, 64, 128>}, {pipeline_mode = #tpu.pipeline_mode<synchronous>, transform_indices = @transform_3, window_bounds = array<i64: 1, 128>}, {pipeline_mode = #tpu.pipeline_mode<synchronous>, transform_indices = @transform_4, window_bounds = array<i64: 3, 128, 128>}, {pipeline_mode = #tpu.pipeline_mode<synchronous>, transform_indices = @transform_5, window_bounds = array<i64: 1, 128>}, {pipeline_mode = #tpu.pipeline_mode<synchronous>, transform_indices = @transform_6, window_bounds = array<i64: 128, 192>}, {pipeline_mode = #tpu.pipeline_mode<synchronous>, transform_indices = @transform_7, window_bounds = array<i64: 1, 192>}, {pipeline_mode = #tpu.pipeline_mode<synchronous>, transform_indices = @transform_8, window_bounds = array<i64: 192, 128>}, {pipeline_mode = #tpu.pipeline_mode<synchronous>, transform_indices = @transform_9, window_bounds = array<i64: 128, 128>}, {pipeline_mode = #tpu.pipeline_mode<synchronous>, transform_indices = @transform_10, window_bounds = array<i64: 1, 128>}, {pipeline_mode = #tpu.pipeline_mode<synchronous>, transform_indices = @transform_11, window_bounds = array<i64: 128, 128>}, {transform_indices = @transform_12, window_bounds = array<i64: 40, 128>}]} {
    %c0 = arith.constant 0 : index
    %c0_0 = arith.constant 0 : index
    %c0_1 = arith.constant 0 : index
    %0 = vector.load %arg1[%c0, %c0_0, %c0_1] : memref<3x40x64xf32, #tpu.memory_space<vmem>>, vector<1x40x64xf32>
    %1 = vector.shape_cast %0 : vector<1x40x64xf32> to vector<40x64xf32>
    %2 = arith.truncf %1 : vector<40x64xf32> to vector<40x64xbf16>
    %c0_2 = arith.constant 0 : index
    %c0_3 = arith.constant 0 : index
    %c0_4 = arith.constant 0 : index
    %3 = vector.load %arg3[%c0_2, %c0_3, %c0_4] : memref<3x64x128xbf16, #tpu.memory_space<vmem>>, vector<1x64x128xbf16>
    %4 = vector.shape_cast %3 : vector<1x64x128xbf16> to vector<64x128xbf16>
    %cst = arith.constant dense<0.000000e+00> : vector<40x128xf32>
    %5 = tpu.matmul %2, %4, %cst {dimension_numbers = #tpu.dot_dimension_numbers<[1], [0], [0], [1], [0, 0, 1, 1], [], []>} : vector<40x64xbf16>, vector<64x128xbf16>, vector<40x128xf32> -> vector<40x128xf32>
    %c1 = arith.constant 1 : index
    %c0_5 = arith.constant 0 : index
    %c0_6 = arith.constant 0 : index
    %6 = vector.load %arg1[%c1, %c0_5, %c0_6] : memref<3x40x64xf32, #tpu.memory_space<vmem>>, vector<1x40x64xf32>
    %7 = vector.shape_cast %6 : vector<1x40x64xf32> to vector<40x64xf32>
    %8 = arith.truncf %7 : vector<40x64xf32> to vector<40x64xbf16>
    %c1_7 = arith.constant 1 : index
    %c0_8 = arith.constant 0 : index
    %c0_9 = arith.constant 0 : index
    %9 = vector.load %arg3[%c1_7, %c0_8, %c0_9] : memref<3x64x128xbf16, #tpu.memory_space<vmem>>, vector<1x64x128xbf16>
    %10 = vector.shape_cast %9 : vector<1x64x128xbf16> to vector<64x128xbf16>
    %cst_10 = arith.constant dense<0.000000e+00> : vector<40x128xf32>
    %11 = tpu.matmul %8, %10, %cst_10 {dimension_numbers = #tpu.dot_dimension_numbers<[1], [0], [0], [1], [0, 0, 1, 1], [], []>} : vector<40x64xbf16>, vector<64x128xbf16>, vector<40x128xf32> -> vector<40x128xf32>
    %12 = arith.addf %5, %11 : vector<40x128xf32>
    %c2 = arith.constant 2 : index
    %c0_11 = arith.constant 0 : index
    %c0_12 = arith.constant 0 : index
    %13 = vector.load %arg1[%c2, %c0_11, %c0_12] : memref<3x40x64xf32, #tpu.memory_space<vmem>>, vector<1x40x64xf32>
    %14 = vector.shape_cast %13 : vector<1x40x64xf32> to vector<40x64xf32>
    %15 = arith.truncf %14 : vector<40x64xf32> to vector<40x64xbf16>
    %c2_13 = arith.constant 2 : index
    %c0_14 = arith.constant 0 : index
    %c0_15 = arith.constant 0 : index
    %16 = vector.load %arg3[%c2_13, %c0_14, %c0_15] : memref<3x64x128xbf16, #tpu.memory_space<vmem>>, vector<1x64x128xbf16>
    %17 = vector.shape_cast %16 : vector<1x64x128xbf16> to vector<64x128xbf16>
    %cst_16 = arith.constant dense<0.000000e+00> : vector<40x128xf32>
    %18 = tpu.matmul %15, %17, %cst_16 {dimension_numbers = #tpu.dot_dimension_numbers<[1], [0], [0], [1], [0, 0, 1, 1], [], []>} : vector<40x64xbf16>, vector<64x128xbf16>, vector<40x128xf32> -> vector<40x128xf32>
    %19 = arith.addf %12, %18 : vector<40x128xf32>
    %c0_17 = arith.constant 0 : index
    %c0_18 = arith.constant 0 : index
    %20 = vector.load %arg4[%c0_17, %c0_18] : memref<1x128xf32, #tpu.memory_space<vmem>>, vector<1x128xf32>
    %21 = vector.broadcast %20 : vector<1x128xf32> to vector<40x128xf32>
    %22 = arith.addf %19, %21 : vector<40x128xf32>
    %cst_19 = arith.constant 0.000000e+00 : f32
    %23 = vector.broadcast %cst_19 : f32 to vector<40x128xf32>
    %24 = arith.maximumf %22, %23 : vector<40x128xf32>
    %c0_20 = arith.constant 0 : index
    %c0_21 = arith.constant 0 : index
    %25 = vector.load %arg2[%c0_20, %c0_21] : memref<40x1xf32, #tpu.memory_space<vmem>>, vector<40x1xf32>
    %26 = vector.broadcast %25 : vector<40x1xf32> to vector<40x128xf32>
    %27 = arith.mulf %24, %26 : vector<40x128xf32>
    %28 = vector.extract_strided_slice %27 {offsets = [0, 0], sizes = [38, 128], strides = [1, 1]} : vector<40x128xf32> to vector<38x128xf32>
    %29 = arith.truncf %28 : vector<38x128xf32> to vector<38x128xbf16>
    %c0_22 = arith.constant 0 : index
    %c0_23 = arith.constant 0 : index
    %c0_24 = arith.constant 0 : index
    %30 = vector.load %arg5[%c0_22, %c0_23, %c0_24] : memref<3x128x128xbf16, #tpu.memory_space<vmem>>, vector<1x128x128xbf16>
    %31 = vector.shape_cast %30 : vector<1x128x128xbf16> to vector<128x128xbf16>
    %cst_25 = arith.constant dense<0.000000e+00> : vector<38x128xf32>
    %32 = tpu.matmul %29, %31, %cst_25 {dimension_numbers = #tpu.dot_dimension_numbers<[1], [0], [0], [1], [0, 0, 1, 1], [], []>} : vector<38x128xbf16>, vector<128x128xbf16>, vector<38x128xf32> -> vector<38x128xf32>
    %33 = vector.extract_strided_slice %27 {offsets = [1, 0], sizes = [38, 128], strides = [1, 1]} : vector<40x128xf32> to vector<38x128xf32>
    %34 = arith.truncf %33 : vector<38x128xf32> to vector<38x128xbf16>
    %c1_26 = arith.constant 1 : index
    %c0_27 = arith.constant 0 : index
    %c0_28 = arith.constant 0 : index
    %35 = vector.load %arg5[%c1_26, %c0_27, %c0_28] : memref<3x128x128xbf16, #tpu.memory_space<vmem>>, vector<1x128x128xbf16>
    %36 = vector.shape_cast %35 : vector<1x128x128xbf16> to vector<128x128xbf16>
    %cst_29 = arith.constant dense<0.000000e+00> : vector<38x128xf32>
    %37 = tpu.matmul %34, %36, %cst_29 {dimension_numbers = #tpu.dot_dimension_numbers<[1], [0], [0], [1], [0, 0, 1, 1], [], []>} : vector<38x128xbf16>, vector<128x128xbf16>, vector<38x128xf32> -> vector<38x128xf32>
    %38 = arith.addf %32, %37 : vector<38x128xf32>
    %39 = vector.extract_strided_slice %27 {offsets = [2, 0], sizes = [38, 128], strides = [1, 1]} : vector<40x128xf32> to vector<38x128xf32>
    %40 = arith.truncf %39 : vector<38x128xf32> to vector<38x128xbf16>
    %c2_30 = arith.constant 2 : index
    %c0_31 = arith.constant 0 : index
    %c0_32 = arith.constant 0 : index
    %41 = vector.load %arg5[%c2_30, %c0_31, %c0_32] : memref<3x128x128xbf16, #tpu.memory_space<vmem>>, vector<1x128x128xbf16>
    %42 = vector.shape_cast %41 : vector<1x128x128xbf16> to vector<128x128xbf16>
    %cst_33 = arith.constant dense<0.000000e+00> : vector<38x128xf32>
    %43 = tpu.matmul %40, %42, %cst_33 {dimension_numbers = #tpu.dot_dimension_numbers<[1], [0], [0], [1], [0, 0, 1, 1], [], []>} : vector<38x128xbf16>, vector<128x128xbf16>, vector<38x128xf32> -> vector<38x128xf32>
    %44 = arith.addf %38, %43 : vector<38x128xf32>
    %c0_34 = arith.constant 0 : index
    %c0_35 = arith.constant 0 : index
    %45 = vector.load %arg6[%c0_34, %c0_35] : memref<1x128xf32, #tpu.memory_space<vmem>>, vector<1x128xf32>
    %46 = vector.broadcast %45 : vector<1x128xf32> to vector<38x128xf32>
    %47 = arith.addf %44, %46 : vector<38x128xf32>
    %cst_36 = arith.constant 0.000000e+00 : f32
    %48 = vector.broadcast %cst_36 : f32 to vector<38x128xf32>
    %49 = arith.maximumf %47, %48 : vector<38x128xf32>
    %50 = arith.truncf %49 : vector<38x128xf32> to vector<38x128xbf16>
    %c0_37 = arith.constant 0 : index
    %c0_38 = arith.constant 0 : index
    %51 = vector.load %arg7[%c0_37, %c0_38] : memref<128x192xbf16, #tpu.memory_space<vmem>>, vector<128x192xbf16>
    %cst_39 = arith.constant dense<0.000000e+00> : vector<38x192xf32>
    %52 = tpu.matmul %50, %51, %cst_39 {dimension_numbers = #tpu.dot_dimension_numbers<[1], [0], [0], [1], [0, 0, 1, 1], [], []>} : vector<38x128xbf16>, vector<128x192xbf16>, vector<38x192xf32> -> vector<38x192xf32>
    %c0_40 = arith.constant 0 : index
    %c0_41 = arith.constant 0 : index
    %53 = vector.load %arg8[%c0_40, %c0_41] : memref<1x192xf32, #tpu.memory_space<vmem>>, vector<1x192xf32>
    %54 = vector.broadcast %53 : vector<1x192xf32> to vector<38x192xf32>
    %55 = arith.addf %52, %54 : vector<38x192xf32>
    %cst_42 = arith.constant 0.000000e+00 : f32
    %56 = vector.broadcast %cst_42 : f32 to vector<38x192xf32>
    %57 = arith.maximumf %55, %56 : vector<38x192xf32>
    %58 = arith.truncf %57 : vector<38x192xf32> to vector<38x192xbf16>
    %c0_43 = arith.constant 0 : index
    %c0_44 = arith.constant 0 : index
    %59 = vector.load %arg9[%c0_43, %c0_44] : memref<192x128xbf16, #tpu.memory_space<vmem>>, vector<192x128xbf16>
    %cst_45 = arith.constant dense<0.000000e+00> : vector<38x128xf32>
    %60 = tpu.matmul %58, %59, %cst_45 {dimension_numbers = #tpu.dot_dimension_numbers<[1], [0], [0], [1], [0, 0, 1, 1], [], []>} : vector<38x192xbf16>, vector<192x128xbf16>, vector<38x128xf32> -> vector<38x128xf32>
    %c0_46 = arith.constant 0 : index
    %c0_47 = arith.constant 0 : index
    %61 = vector.load %arg10[%c0_46, %c0_47] : memref<128x128xbf16, #tpu.memory_space<vmem>>, vector<128x128xbf16>
    %cst_48 = arith.constant dense<0.000000e+00> : vector<38x128xf32>
    %62 = tpu.matmul %50, %61, %cst_48 {dimension_numbers = #tpu.dot_dimension_numbers<[1], [0], [0], [1], [0, 0, 1, 1], [], []>} : vector<38x128xbf16>, vector<128x128xbf16>, vector<38x128xf32> -> vector<38x128xf32>
    %63 = arith.addf %60, %62 : vector<38x128xf32>
    %c0_49 = arith.constant 0 : index
    %c0_50 = arith.constant 0 : index
    %64 = vector.load %arg11[%c0_49, %c0_50] : memref<1x128xf32, #tpu.memory_space<vmem>>, vector<1x128xf32>
    %65 = vector.broadcast %64 : vector<1x128xf32> to vector<38x128xf32>
    %66 = arith.addf %63, %65 : vector<38x128xf32>
    %cst_51 = arith.constant dense<0xFF800000> : vector<38xf32>
    %67 = vector.multi_reduction <maximumf>, %66, %cst_51 [1] : vector<38x128xf32> to vector<38xf32>
    %68 = vector.shape_cast %67 : vector<38xf32> to vector<38x1xf32>
    %69 = vector.broadcast %68 : vector<38x1xf32> to vector<38x128xf32>
    %70 = arith.subf %66, %69 : vector<38x128xf32>
    %71 = math.exp %70 : vector<38x128xf32>
    %c0_52 = arith.constant 0 : index
    %c0_53 = arith.constant 0 : index
    %72 = vector.load %arg12[%c0_52, %c0_53] : memref<128x128xf32, #tpu.memory_space<vmem>>, vector<128x128xf32>
    %cst_54 = arith.constant dense<0.000000e+00> : vector<38x128xf32>
    %73 = tpu.matmul %71, %72, %cst_54 {dimension_numbers = #tpu.dot_dimension_numbers<[1], [0], [0], [1], [0, 0, 1, 1], [], []>} : vector<38x128xf32>, vector<128x128xf32>, vector<38x128xf32> -> vector<38x128xf32>
    %74 = tpu.reciprocal %73 : vector<38x128xf32> -> vector<38x128xf32>
    %75 = arith.mulf %71, %74 : vector<38x128xf32>
    %76 = tpu.iota {dimensions = array<i32: 1>} : vector<38x128xi32>
    %c120_i32 = arith.constant 120 : i32
    %77 = vector.broadcast %c120_i32 : i32 to vector<38x128xi32>
    %78 = arith.cmpi slt, %76, %77 : vector<38x128xi32>
    %79 = arith.select %78, %75, %66 : vector<38x128xi1>, vector<38x128xf32>
    %c0_55 = arith.constant 0 : index
    %c0_56 = arith.constant 0 : index
    %80 = vector.load %arg13[%c0_55, %c0_56] : memref<40x128xf32, #tpu.memory_space<vmem>>, vector<38x128xf32>
    tpu.vector_store %arg13[%c0_55, %c0_56], %79 {strides = array<i32>} : memref<40x128xf32, #tpu.memory_space<vmem>>, vector<38x128xf32>,
    return
  }
  func.func @transform_0(%arg0: i32) -> (i32, i32, i32) {
    %c0_i32 = arith.constant 0 : i32
    %c0_i32_0 = arith.constant 0 : i32
    %c0_i32_1 = arith.constant 0 : i32
    return %c0_i32, %arg0, %c0_i32_0 : i32, i32, i32
  }
  func.func @transform_1(%arg0: i32) -> (i32, i32) {
    %c0_i32 = arith.constant 0 : i32
    %c0_i32_0 = arith.constant 0 : i32
    %c0_i32_1 = arith.constant 0 : i32
    return %c0_i32, %c0_i32_0 : i32, i32
  }
  func.func @transform_2(%arg0: i32) -> (i32, i32, i32) {
    %c0_i32 = arith.constant 0 : i32
    %c0_i32_0 = arith.constant 0 : i32
    %c0_i32_1 = arith.constant 0 : i32
    %c0_i32_2 = arith.constant 0 : i32
    return %c0_i32, %c0_i32_0, %c0_i32_1 : i32, i32, i32
  }
  func.func @transform_3(%arg0: i32) -> (i32, i32) {
    %c0_i32 = arith.constant 0 : i32
    %c0_i32_0 = arith.constant 0 : i32
    %c0_i32_1 = arith.constant 0 : i32
    return %c0_i32, %c0_i32_0 : i32, i32
  }
  func.func @transform_4(%arg0: i32) -> (i32, i32, i32) {
    %c0_i32 = arith.constant 0 : i32
    %c0_i32_0 = arith.constant 0 : i32
    %c0_i32_1 = arith.constant 0 : i32
    %c0_i32_2 = arith.constant 0 : i32
    return %c0_i32, %c0_i32_0, %c0_i32_1 : i32, i32, i32
  }
  func.func @transform_5(%arg0: i32) -> (i32, i32) {
    %c0_i32 = arith.constant 0 : i32
    %c0_i32_0 = arith.constant 0 : i32
    %c0_i32_1 = arith.constant 0 : i32
    return %c0_i32, %c0_i32_0 : i32, i32
  }
  func.func @transform_6(%arg0: i32) -> (i32, i32) {
    %c0_i32 = arith.constant 0 : i32
    %c0_i32_0 = arith.constant 0 : i32
    %c0_i32_1 = arith.constant 0 : i32
    return %c0_i32, %c0_i32_0 : i32, i32
  }
  func.func @transform_7(%arg0: i32) -> (i32, i32) {
    %c0_i32 = arith.constant 0 : i32
    %c0_i32_0 = arith.constant 0 : i32
    %c0_i32_1 = arith.constant 0 : i32
    return %c0_i32, %c0_i32_0 : i32, i32
  }
  func.func @transform_8(%arg0: i32) -> (i32, i32) {
    %c0_i32 = arith.constant 0 : i32
    %c0_i32_0 = arith.constant 0 : i32
    %c0_i32_1 = arith.constant 0 : i32
    return %c0_i32, %c0_i32_0 : i32, i32
  }
  func.func @transform_9(%arg0: i32) -> (i32, i32) {
    %c0_i32 = arith.constant 0 : i32
    %c0_i32_0 = arith.constant 0 : i32
    %c0_i32_1 = arith.constant 0 : i32
    return %c0_i32, %c0_i32_0 : i32, i32
  }
  func.func @transform_10(%arg0: i32) -> (i32, i32) {
    %c0_i32 = arith.constant 0 : i32
    %c0_i32_0 = arith.constant 0 : i32
    %c0_i32_1 = arith.constant 0 : i32
    return %c0_i32, %c0_i32_0 : i32, i32
  }
  func.func @transform_11(%arg0: i32) -> (i32, i32) {
    %c0_i32 = arith.constant 0 : i32
    %c0_i32_0 = arith.constant 0 : i32
    %c0_i32_1 = arith.constant 0 : i32
    return %c0_i32, %c0_i32_0 : i32, i32
  }
  func.func @transform_12(%arg0: i32) -> (i32, i32) {
    %c0_i32 = arith.constant 0 : i32
    %c0_i32_0 = arith.constant 0 : i32
    return %arg0, %c0_i32 : i32, i32
  }
}

</mosaic_0001>

<bundles_post_ra>
// kernel: tile.13
= control target key start
LH: loop header
LB: loop body
LE: loop exit
PB: predicated region body
PF: predicated region fallthrough
CT: control target
= control target key end

     0   :  { %s28_s0 = inlined_call_operand.vmem [shape: f32[8], index: 0, kind: input, shape index: {}]   ;;  %s29_s1 = inlined_call_operand.vmem [shape: f32[16,8], index: 1, kind: output, shape index: {}]  }
   0x1   :  { %v4_v0 = vld [vmem:[%s28_s0] ss:$0 sm:$0xff] }
   0x2   :  { %5 = vst [vmem:[%s29_s1] sm:$0xff] %v4_v0  ;;  %8 = vst [vmem:[%s29_s1 + $0x8] sm:$0xff] %v4_v0 }

// kernel: tile.14
= control target key start
LH: loop header
LB: loop body
LE: loop exit
PB: predicated region body
PF: predicated region fallthrough
CT: control target
= control target key end

     0   :  { %s133_s10 = smov 120   ;;  %s134_s11 = smov 104   ;;  %vm3_vm0 = vcmask 64512   ;;  %vm9_vm1 = vcmask 1048512   ;;  %vm15_vm2 = vcmask 982912   ;;  %vm21_vm3 = vcmask 917312   ;;  %s209_s0 = inlined_call_operand.vmem [shape: f32[16,8], index: 0, kind: input, shape index: {}]   ;;  %s210_s1 = inlined_call_operand.vmem [shape: f32[1,128], index: 1, kind: output, shape index: {}]  }
   0x1   :  { %v103_v0 = vld [vmem:[%s209_s0 + $0xf] sm:$0x1]   ;;  %v105_v1 = vld [vmem:[%s209_s0 + $0xd] sm:$0x1]   ;;  %v104_v2 = vld [vmem:[%s209_s0 + $0xe] sm:$0x1]  }
   0x2   :  { %7 = vrot.lane.b32.xlu0 %v103_v0, %s133_s10  ;;  %19 = vrot.lane.b32.xlu1 %v105_v1, %s134_s11  ;;  %v106_v3 = vld [vmem:[%s209_s0 + $0xc] sm:$0x1]   ;;  %s135_s16 = smov 112   ;;  %s136_s17 = smov 96   ;;  %v107_v4 = vld [vmem:[%s209_s0 + $0xb] sm:$0x1]  }
   0x3   :  { %v108_v5 = vld [vmem:[%s209_s0 + $0xa] sm:$0x1]   ;;  %v2_v6 = vld [vmem:[%s209_s0] sm:$0x1]   ;;  %s137_s24 = smov 88   ;;  %s138_s25 = smov 80  }
   0x4   :  { %4 = vst.msk [vmem:[#allocation0] sm:$0x1] %vm3_vm0, %v2_v6   ;;  %v109_v7 = vld [vmem:[%s209_s0 + $0x9] sm:$0x1]   ;;  %v110_v8 = vld [vmem:[%s209_s0 + $0x8] sm:$0x1]  }
   0x5   :  { %s139_s30 = smov 72   ;;  %s140_s2 = smov 64   ;;  %v111_v9 = vld [vmem:[%s209_s0 + $0x7] sm:$0x1]   ;;  %v112_v10 = vld [vmem:[%s209_s0 + $0x6] sm:$0x1]  }
   0x6   :  { %13 = vrot.lane.b32.xlu0 %v104_v2, %s135_s16  ;;  %25 = vrot.lane.b32.xlu1 %v106_v3, %s136_s17  ;;  %s141_s7 = smov 56   ;;  %s142_s8 = smov 48   ;;  %v113_v11 = vld [vmem:[%s209_s0 + $0x5] sm:$0x1]   ;;  %v114_v12 = vld [vmem:[%s209_s0 + $0x4] sm:$0x1]  }
   0x7   :  { %s143_s13 = smov 40   ;;  %s144_s14 = smov 32   ;;  %v115_v13 = vld [vmem:[%s209_s0 + $0x3] sm:$0x1]   ;;  %v116_v14 = vld [vmem:[%s209_s0 + $0x2] sm:$0x1]  }
   0x8   :  { %s145_s19 = smov 24   ;;  %s146_s20 = smov 16   ;;  %v117_v15 = vld [vmem:[%s209_s0 + $0x1] sm:$0x1]   ;;  %vm27_vm4 = vcmask 851712   ;;  %vm33_vm5 = vcmask 786112  }
   0x9   :  { %s147_s0 = smov 8   ;;  %vm39_vm6 = vcmask 720512   ;;  %vm45_vm7 = vcmask 654912   ;;  %vm51_vm8 = vcmask 589312   ;;  %vm57_vm9 = vcmask 523712  }
   0xa   :  { %31 = vrot.lane.b32.xlu0 %v107_v4, %s137_s24  ;;  %37 = vrot.lane.b32.xlu1 %v108_v5, %s138_s25  ;;  %vm63_vm10 = vcmask 458112   ;;  %vm69_vm11 = vcmask 392512   ;;  %vm75_vm12 = vcmask 326912   ;;  %vm81_vm13 = vcmask 261312  }
   0xb   :  { %vm87_vm14 = vcmask 195712   ;;  %vm93_vm15 = vcmask 130112  }
   0xe   :  { %43 = vrot.lane.b32.xlu0 %v109_v7, %s139_s30  ;;  %49 = vrot.lane.b32.xlu1 %v110_v8, %s140_s2 }
  0x12   :  { %55 = vrot.lane.b32.xlu0 %v111_v9, %s141_s7  ;;  %61 = vrot.lane.b32.xlu1 %v112_v10, %s142_s8 }
  0x16   :  { %67 = vrot.lane.b32.xlu0 %v113_v11, %s143_s13  ;;  %73 = vrot.lane.b32.xlu1 %v114_v12, %s144_s14 }
  0x1a   :  { %79 = vrot.lane.b32.xlu0 %v115_v13, %s145_s19  ;;  %85 = vrot.lane.b32.xlu1 %v116_v14, %s146_s20 }
  0x1e   :  { %91 = vrot.lane.b32.xlu0 %v117_v15, %s147_s0 }
  0x74   :  { %v8_v16 = vpop.permute.xlu0 %7   ;;  %v20_v17 = vpop.permute.xlu1 %19  }
  0x75   :  { %10 = vst.msk [vmem:[#allocation0] sm:$0x1] %vm9_vm1, %v8_v16  }
  0x78   :  { %v14_v18 = vpop.permute.xlu0 %13   ;;  %v26_v19 = vpop.permute.xlu1 %25  }
  0x79   :  { %16 = vst.msk [vmem:[#allocation0] sm:$0x1] %vm15_vm2, %v14_v18  }
  0x7a   :  { %22 = vst.msk [vmem:[#allocation0] sm:$0x1] %vm21_vm3, %v20_v17  }
  0x7b   :  { %28 = vst.msk [vmem:[#allocation0] sm:$0x1] %vm27_vm4, %v26_v19  }
  0x7c   :  { %v32_v20 = vpop.permute.xlu0 %31   ;;  %v38_v21 = vpop.permute.xlu1 %37  }
  0x7d   :  { %34 = vst.msk [vmem:[#allocation0] sm:$0x1] %vm33_vm5, %v32_v20  }
  0x7e   :  { %40 = vst.msk [vmem:[#allocation0] sm:$0x1] %vm39_vm6, %v38_v21  }
  0x80   :  { %v44_v22 = vpop.permute.xlu0 %43   ;;  %v50_v23 = vpop.permute.xlu1 %49  }
  0x81   :  { %46 = vst.msk [vmem:[#allocation0] sm:$0x1] %vm45_vm7, %v44_v22  }
  0x82   :  { %52 = vst.msk [vmem:[#allocation0] sm:$0x1] %vm51_vm8, %v50_v23  }
  0x84   :  { %v56_v24 = vpop.permute.xlu0 %55   ;;  %v62_v25 = vpop.permute.xlu1 %61  }
  0x85   :  { %58 = vst.msk [vmem:[#allocation0] sm:$0x1] %vm57_vm9, %v56_v24  }
  0x86   :  { %64 = vst.msk [vmem:[#allocation0] sm:$0x1] %vm63_vm10, %v62_v25  }
  0x88   :  { %v68_v26 = vpop.permute.xlu0 %67   ;;  %v74_v27 = vpop.permute.xlu1 %73  }
  0x89   :  { %70 = vst.msk [vmem:[#allocation0] sm:$0x1] %vm69_vm11, %v68_v26  }
  0x8a   :  { %76 = vst.msk [vmem:[#allocation0] sm:$0x1] %vm75_vm12, %v74_v27  }
  0x8c   :  { %v80_v28 = vpop.permute.xlu0 %79   ;;  %v86_v29 = vpop.permute.xlu1 %85  }
  0x8d   :  { %82 = vst.msk [vmem:[#allocation0] sm:$0x1] %vm81_vm13, %v80_v28  }
  0x8e   :  { %88 = vst.msk [vmem:[#allocation0] sm:$0x1] %vm87_vm14, %v86_v29  }
  0x90   :  { %v92_v30 = vpop.permute.xlu0 %91  }
  0x91   :  { %94 = vst.msk [vmem:[#allocation0] sm:$0x1] %vm93_vm15, %v92_v30  }
  0x98   :  { %v99_v31 = vld [vmem:[#allocation0] sm:$0x1] }
  0x99   :  { %102 = vst [vmem:[%s210_s1] sm:$0x1] %v99_v31 }

// kernel: cnn_forward.1
= control target key start
LH: loop header
LB: loop body
LE: loop exit
PB: predicated region body
PF: predicated region fallthrough
CT: control target
= control target key end

     0   :  { %v2041_v0 = vmov 0.0   ;;  %vm2042_vm0 = vmmov 0   ;;  %v2043_v4 = vmov 0   ;;  %vm100_vm1 = vcmask 523264   ;;  %s2656_s2 = inlined_call_operand.vmem [shape: bf16[3,64,128], index: 2, kind: input, shape index: {}]   ;;  %s2657_s0 = inlined_call_operand.vmem [shape: f32[3,40,64], index: 0, kind: input, shape index: {}]   ;;  %s2658_s1 = inlined_call_operand.vmem [shape: f32[40,1], index: 1, kind: input, shape index: {}]   ;;  %s2659_s4 = inlined_call_operand.vmem [shape: bf16[3,128,128], index: 4, kind: input, shape index: {}]   ;;  %s2660_s3 = inlined_call_operand.vmem [shape: f32[1,128], index: 3, kind: input, shape index: {}]   ;;  %s2661_s6 = inlined_call_operand.vmem [shape: bf16[128,192], index: 6, kind: input, shape index: {}]   ;;  %s2662_s9 = inlined_call_operand.vmem [shape: bf16[128,128], index: 9, kind: input, shape index: {}]   ;;  %s2663_s8 = inlined_call_operand.vmem [shape: bf16[192,128], index: 8, kind: input, shape index: {}]   ;;  %s2664_s5 = inlined_call_operand.vmem [shape: f32[1,128], index: 5, kind: input, shape index: {}]   ;;  %s2665_s7 = inlined_call_operand.vmem [shape: f32[1,192], index: 7, kind: input, shape index: {}]   ;;  %s2666_s11 = inlined_call_operand.vmem [shape: f32[128,128], index: 11, kind: input, shape index: {}]   ;;  %s2667_s10 = inlined_call_operand.vmem [shape: f32[1,128], index: 10, kind: input, shape index: {}]   ;;  %s2668_s12 = inlined_call_operand.vmem [shape: f32[40,128], index: 12, kind: output, shape index: {}]  }
   0x1   :  { %1717 = vmatprep.subr.bf16.mxu0 %v2041_v0  ;;  %1737 = vmatprep.subr.bf16.mxu1 %v2041_v0  ;;  %v1941_v1 = vld [vmem:[%s2656_s2 + $0x38] sm:$0xff]   ;;  %v1943_v3 = vld [vmem:[%s2656_s2 + $0x30] sm:$0xff]   ;;  %v1945_v6 = vld [vmem:[%s2656_s2 + $0x28] sm:$0xff]   ;;  %vm455_vm2 = vsmask.f32 7424  ;;  %vm710_vm3 = vcmask 1046528  }
   0x2   :  { %v1942_v2 = vld [vmem:[%s2656_s2 + $0x18] sm:$0xff]   ;;  %1725 = vmatprep.mubr.msk.bf16.mxu0 %vm2042_vm0, %v2041_v0  ;;  %1745 = vmatprep.mubr.msk.bf16.mxu1 %vm2042_vm0, %v2041_v0  ;;  %v1944_v5 = vld [vmem:[%s2656_s2 + $0x10] sm:$0xff]   ;;  %v1946_v7 = vld [vmem:[%s2656_s2 + $0x8] sm:$0xff]   ;;  %vm1334_vm4 = vcmask 1045504  }
   0x3   :  { %1718 = vmatpush3.bf16.msra.mxu0 %v1941_v1  ;;  %1939 = vset.pattern.permute.xlu0 %v2043_v4  ;;  %v1947_v8 = vld [vmem:[%s2656_s2 + $0x20] sm:$0xff]   ;;  %v1486_v9 = vld [vmem:[%s2657_s0 + $0x28] sm:$0xff]  ;;  %v1487_v10 = vld [vmem:[%s2657_s0 + $0x30] sm:$0xff] }
   0x4   :  { %1738 = vmatpush3.bf16.msra.mxu1 %v1942_v2  ;;  %1719 = vmatprep.subr.bf16.mxu0 %v2041_v0  ;;  %v1948_v11 = vld [vmem:[%s2656_s2] sm:$0xff]   ;;  %v43_v13 = vld [vmem:[%s2657_s0 + $0x8] sm:$0xff]  ;;  %v64_v14 = vpack.c.bf16 %v1487_v10, %v1486_v9  ;;  %v1949_v16 = vld [vmem:[%s2656_s2 + $0x58] sm:$0xff]  }
   0x5   :  { %1739 = vmatprep.subr.bf16.mxu1 %v2041_v0  ;;  %1940 = vset.pattern.permute.xlu1 %v2043_v4  ;;  %v42_v12 = vld [vmem:[%s2657_s0] sm:$0xff]  ;;  %v1950_v17 = vld [vmem:[%s2656_s2 + $0x50] sm:$0xff]   ;;  %v1488_v19 = vld [vmem:[%s2657_s0 + $0x38] sm:$0xff] }
   0x6   :  { %v47_v15 = vpack.c.bf16 %v43_v13, %v42_v12  ;;  %v384_v18 = vld [vmem:[%s2658_s1] sm:$0xff]  ;;  %v386_v21 = vld [vmem:[%s2658_s1 + $0x10] sm:$0xff]  ;;  %v45_v23 = vld [vmem:[%s2657_s0 + $0x18] sm:$0xff] }
   0x7   :  { %1720 = vmatpush3.bf16.msra.mxu0 %v1943_v3  ;;  %v1489_v20 = vld [vmem:[%s2657_s0 + $0x40] sm:$0xff]  ;;  %v44_v22 = vld [vmem:[%s2657_s0 + $0x10] sm:$0xff]  ;;  %391 = vperm.xlu0 %1939, %v384_v18   ;;  %v385_v25 = vld [vmem:[%s2658_s1 + $0x8] sm:$0xff] }
   0x8   :  { %1740 = vmatpush3.bf16.msra.mxu1 %v1944_v5  ;;  %1721 = vmatprep.subr.bf16.mxu0 %v2041_v0  ;;  %v65_v24 = vpack.c.bf16 %v1489_v20, %v1488_v19  ;;  %v48_v26 = vpack.c.bf16 %v45_v23, %v44_v22  ;;  %v1951_v27 = vld [vmem:[%s2656_s2 + $0x48] sm:$0xff]   ;;  %v387_v28 = vld [vmem:[%s2658_s1 + $0x18] sm:$0xff]  ;;  %v388_v29 = vld [vmem:[%s2658_s1 + $0x20] sm:$0xff] }
   0x9   :  { %1741 = vmatprep.subr.bf16.mxu1 %v2041_v0  ;;  %401 = vperm.xlu1 %1940, %v386_v21   ;;  %v1490_v30 = vld [vmem:[%s2657_s0 + $0x48] sm:$0xff]  ;;  %v1952_v31 = vld [vmem:[%s2656_s2 + $0x40] sm:$0xff]   ;;  %v1513_v35 = vld [vmem:[%s2657_s0 + $0x50] sm:$0xff] }
   0xa   :  { %v46_v32 = vld [vmem:[%s2657_s0 + $0x20] sm:$0xff]  ;;  %v66_v33 = vpack.c.bf16 %v1490_v30, %v1490_v30  ;;  %v1514_v36 = vld [vmem:[%s2657_s0 + $0x58] sm:$0xff]  ;;  %v1516_v39 = vld [vmem:[%s2657_s0 + $0x68] sm:$0xff] }
   0xb   :  { %1722 = vmatpush3.bf16.msra.mxu0 %v1945_v6  ;;  %396 = vperm.xlu0 %1939, %v385_v25   ;;  %v49_v34 = vpack.c.bf16 %v46_v32, %v46_v32  ;;  %v261_v37 = vpack.c.bf16 %v1514_v36, %v1513_v35  ;;  %v1515_v38 = vld [vmem:[%s2657_s0 + $0x60] sm:$0xff]  ;;  %v1517_v41 = vld [vmem:[%s2657_s0 + $0x70] sm:$0xff]  ;;  %v1953_v43 = vld [vmem:[%s2659_s4 + $0x38] sm:$0xff]  }
   0xc   :  { %1742 = vmatpush3.bf16.msra.mxu1 %v1946_v7  ;;  %1723 = vmatprep.subr.bf16.mxu0 %v2041_v0  ;;  %v262_v40 = vpack.c.bf16 %v1516_v39, %v1515_v38  ;;  %v263_v42 = vpack.c.bf16 %v1517_v41, %v1517_v41  ;;  %v1954_v44 = vld [vmem:[%s2659_s4 + $0x30] sm:$0xff]   ;;  %v1955_v45 = vld [vmem:[%s2659_s4 + $0x28] sm:$0xff]   ;;  %v1956_v46 = vld [vmem:[%s2659_s4 + $0x78] sm:$0xff]  }
   0xd   :  { %1743 = vmatprep.subr.bf16.mxu1 %v2041_v0  ;;  %406 = vperm.xlu1 %1940, %v387_v28   ;;  %v1957_v47 = vld [vmem:[%s2659_s4 + $0x20] sm:$0xff]   ;;  %v1958_v48 = vld [vmem:[%s2659_s4 + $0x70] sm:$0xff]   ;;  %v1959_v49 = vld [vmem:[%s2659_s4 + $0x18] sm:$0xff]  }
   0xe   :  { %v1960_v50 = vld [vmem:[%s2659_s4 + $0x68] sm:$0xff]   ;;  %v1961_v51 = vld [vmem:[%s2659_s4 + $0x10] sm:$0xff]   ;;  %v1962_v52 = vld [vmem:[%s2659_s4 + $0x60] sm:$0xff]  }
   0xf   :  { %1724 = vmatpush3.bf16.msra.mxu0 %v1947_v8  ;;  %411 = vperm.xlu0 %1939, %v388_v29   ;;  %v1963_v53 = vld [vmem:[%s2659_s4 + $0x8] sm:$0xff]   ;;  %v1964_v54 = vld [vmem:[%s2659_s4 + $0x58] sm:$0xff]   ;;  %v1965_v55 = vld [vmem:[%s2659_s4] sm:$0xff]  }
  0x10   :  { %1744 = vmatpush3.bf16.msra.mxu1 %v1948_v11  ;;  %1757 = vmatprep.subr.bf16.mxu0 %v2041_v0  ;;  %v1966_v56 = vld [vmem:[%s2659_s4 + $0x50] sm:$0xff]   ;;  %v1967_v57 = vld [vmem:[%s2659_s4 + $0x48] sm:$0xff]   ;;  %v1968_v58 = vld [vmem:[%s2659_s4 + $0x40] sm:$0xff]  }
  0x11   :  { %1777 = vmatprep.subr.bf16.mxu1 %v2041_v0  ;;  %v1533_v23 = vld [vmem:[%s2660_s3] ss:$0 sm:$0xff] }
  0x12   :  { %1726 = vmatmul.mubr.msk.bf16.vlgmr.msra.gmra.mxu0 %vm100_vm1, %v64_v14 }
  0x13   :  { %1746 = vmatmul.mubr.msk.bf16.vlgmr.msra.gmra.mxu1 %vm100_vm1, %v47_v15  ;;  %1758 = vmatpush3.bf16.msra.mxu0 %v1949_v16 }
  0x14   :  { %1759 = vmatprep.subr.bf16.mxu0 %v2041_v0  ;;  %1729 = vmatprep.mubr.msk.bf16.mxu0 %vm2042_vm0, %v2041_v0 }
  0x15   :  { %1749 = vmatprep.mubr.msk.bf16.mxu1 %vm2042_vm0, %v2041_v0  ;;  %1778 = vmatpush3.bf16.msra.mxu1 %v1956_v46 }
  0x16   :  { %1779 = vmatprep.subr.bf16.mxu1 %v2041_v0 }
  0x17   :  { %1760 = vmatpush3.bf16.msra.mxu0 %v1950_v17 }
  0x18   :  { %1761 = vmatprep.subr.bf16.mxu0 %v2041_v0 }
  0x19   :  { %1780 = vmatpush3.bf16.msra.mxu1 %v1958_v48 }
  0x1a   :  { %1730 = vmatmul.mubr.msk.bf16.gmra.mxu0 %vm100_vm1, %v65_v24  ;;  %1781 = vmatprep.subr.bf16.mxu1 %v2041_v0 }
  0x1b   :  { %1750 = vmatmul.mubr.msk.bf16.gmra.mxu1 %vm100_vm1, %v48_v26  ;;  %1762 = vmatpush3.bf16.msra.mxu0 %v1951_v27 }
  0x1c   :  { %1733 = vmatprep.mubr.msk.bf16.mxu0 %vm2042_vm0, %v2041_v0  ;;  %1753 = vmatprep.mubr.msk.bf16.mxu1 %vm2042_vm0, %v2041_v0 }
  0x1d   :  { %1763 = vmatprep.subr.bf16.mxu0 %v2041_v0  ;;  %1782 = vmatpush3.bf16.msra.mxu1 %v1960_v50 }
  0x1e   :  { %1783 = vmatprep.subr.bf16.mxu1 %v2041_v0 }
  0x1f   :  { %1764 = vmatpush3.bf16.msra.mxu0 %v1952_v31 }
  0x20   :  { %1805 = vmatprep.subr.bf16.mxu0 %v2041_v0 }
  0x21   :  { %1784 = vmatpush3.bf16.msra.mxu1 %v1962_v52 }
  0x22   :  { %1734 = vmatmul.mubr.msk.bf16.gmra.mxu0 %vm100_vm1, %v66_v33  ;;  %1785 = vmatprep.subr.bf16.mxu1 %v2041_v0 }
  0x23   :  { %1754 = vmatmul.mubr.msk.bf16.gmra.mxu1 %vm100_vm1, %v49_v34  ;;  %1765 = vmatprep.mubr.msk.bf16.mxu0 %vm2042_vm0, %v2041_v0 }
  0x24   :  { %1793 = vmatprep.mubr.msk.bf16.mxu1 %vm2042_vm0, %v2041_v0 }
  0x25   :  { %1786 = vmatpush3.bf16.msra.mxu1 %v1964_v54 }
  0x26   :  { %1787 = vmatprep.subr.bf16.mxu1 %v2041_v0 }
  0x29   :  { %1788 = vmatpush3.bf16.msra.mxu1 %v1966_v56 }
  0x2a   :  { %1766 = vmatmul.mubr.msk.bf16.vlgmr.msra.gmra.mxu0 %vm100_vm1, %v261_v37  ;;  %1789 = vmatprep.subr.bf16.mxu1 %v2041_v0 }
  0x2b   :  { %1769 = vmatprep.mubr.msk.bf16.mxu0 %vm2042_vm0, %v2041_v0  ;;  %1806 = vmatpush3.bf16.msra.mxu0 %v1953_v43 }
  0x2c   :  { %1807 = vmatprep.subr.bf16.mxu0 %v2041_v0 }
  0x2d   :  { %1790 = vmatpush3.bf16.msra.mxu1 %v1967_v57 }
  0x2e   :  { %1791 = vmatprep.subr.bf16.mxu1 %v2041_v0 }
  0x2f   :  { %1808 = vmatpush3.bf16.msra.mxu0 %v1954_v44 }
  0x30   :  { %1809 = vmatprep.subr.bf16.mxu0 %v2041_v0 }
  0x31   :  { %1792 = vmatpush3.bf16.msra.mxu1 %v1968_v58 }
  0x32   :  { %1770 = vmatmul.mubr.msk.bf16.gmra.mxu0 %vm100_vm1, %v262_v40  ;;  %1833 = vmatprep.subr.bf16.mxu1 %v2041_v0 }
  0x33   :  { %1773 = vmatprep.mubr.msk.bf16.mxu0 %vm2042_vm0, %v2041_v0  ;;  %1810 = vmatpush3.bf16.msra.mxu0 %v1955_v45 }
  0x34   :  { %1811 = vmatprep.subr.bf16.mxu0 %v2041_v0 }
  0x37   :  { %1812 = vmatpush3.bf16.msra.mxu0 %v1957_v47 }
  0x38   :  { %1813 = vmatprep.subr.bf16.mxu0 %v2041_v0 }
  0x3a   :  { %1774 = vmatmul.mubr.msk.bf16.gmra.mxu0 %vm100_vm1, %v263_v42 }
  0x3b   :  { %1821 = vmatprep.mubr.msk.bf16.mxu0 %vm2042_vm0, %v2041_v0  ;;  %1814 = vmatpush3.bf16.msra.mxu0 %v1959_v49 }
  0x3c   :  { %1815 = vmatprep.subr.bf16.mxu0 %v2041_v0 }
  0x3f   :  { %1816 = vmatpush3.bf16.msra.mxu0 %v1961_v51 }
  0x40   :  { %1817 = vmatprep.subr.bf16.mxu0 %v2041_v0 }
  0x43   :  { %1818 = vmatpush3.bf16.msra.mxu0 %v1963_v53 }
  0x44   :  { %1819 = vmatprep.subr.bf16.mxu0 %v2041_v0 }
  0x47   :  { %1820 = vmatpush3.bf16.msra.mxu0 %v1965_v55 }
  0x82   :  { %v392_v29 = vpop.permute.xlu0 %391 }
  0x84   :  { %v402_v44 = vpop.permute.xlu1 %401 }
  0x86   :  { %v397_v38 = vpop.permute.xlu0 %396 }
  0x88   :  { %v407_v56 = vpop.permute.xlu1 %406 }
  0xd2   :  { %v144_v59 = vpop.f32.mrf.mxu0 }
  0xd3   :  { %v233_v60 = vpop.f32.mrf.mxu1 }
  0xd4   :  { %v1727_v61 = vpop.f32.mrf.mxu0  ;;  %v234_v20 = vadd.f32 %v233_v60, %v144_v59 }
  0xd5   :  { %v1747_v62 = vpop.f32.mrf.mxu1 }
  0xd6   :  { %v147_v63 = vpop.f32.mrf.mxu0 }
  0xd7   :  { %v236_v1 = vpop.f32.mrf.mxu1 }
  0xd8   :  { %v1728_v2 = vpop.f32.mrf.mxu0  ;;  %v237_v26 = vadd.f32 %v236_v1, %v147_v63 }
  0xd9   :  { %v1748_v3 = vpop.f32.mrf.mxu1  ;;  %v412_v2 = vpop.permute.xlu0 %411 }
  0xda   :  { %v152_v5 = vpop.f32.mrf.mxu0 }
  0xdb   :  { %v241_v6 = vpop.f32.mrf.mxu1 }
  0xdc   :  { %v1731_v7 = vpop.f32.mrf.mxu0  ;;  %v242_v32 = vadd.f32 %v241_v6, %v152_v5 }
  0xdd   :  { %v1751_v8 = vpop.f32.mrf.mxu1 }
  0xde   :  { %v155_v9 = vpop.f32.mrf.mxu0 }
  0xdf   :  { %v244_v10 = vpop.f32.mrf.mxu1 }
  0xe0   :  { %v1732_v11 = vpop.f32.mrf.mxu0  ;;  %v245_v40 = vadd.f32 %v244_v10, %v155_v9 }
  0xe1   :  { %v1752_v12 = vpop.f32.mrf.mxu1  ;;  %v1969_v11 = vld [vmem:[%s2659_s4 + $0xb8] sm:$0xff]  }
  0xe2   :  { %v160_v13 = vpop.f32.mrf.mxu0 }
  0xe3   :  { %v249_v14 = vpop.f32.mrf.mxu1 }
  0xe4   :  { %v1735_v15 = vpop.f32.mrf.mxu0  ;;  %v250_v49 = vadd.f32 %v249_v14, %v160_v13  ;;  %v1970_v14 = vld [vmem:[%s2659_s4 + $0xb0] sm:$0xff]  }
  0xe5   :  { %v1755_v16 = vpop.f32.mrf.mxu1 }
  0xe6   :  { %v163_v17 = vpop.f32.mrf.mxu0 }
  0xe7   :  { %v252_v18 = vpop.f32.mrf.mxu1 }
  0xe8   :  { %v1736_v19 = vpop.f32.mrf.mxu0  ;;  %v1971_v18 = vld [vmem:[%s2659_s4 + $0xa8] sm:$0xff]  }
  0xe9   :  { %v1756_v21 = vpop.f32.mrf.mxu1 }
  0xea   :  { %v340_v22 = vpop.f32.mrf.mxu0 }
  0xeb   :  { %v362_v24 = vadd.f32 %v340_v22, %v234_v20  ;;  %v1972_v20 = vld [vmem:[%s2659_s4 + $0xa0] sm:$0xff]   ;;  %v1973_v22 = vld [vmem:[%s2659_s4 + $0x98] sm:$0xff]  }
  0xec   :  { %v1767_v25 = vpop.f32.mrf.mxu0 }
  0xed   :  { %v374_v27 = vadd.f32 %v1533_v23, %v362_v24  ;;  %v1974_v24 = vld [vmem:[%s2659_s4 + $0x90] sm:$0xff]   ;;  %v1975_v25 = vld [vmem:[%s2659_s4 + $0x88] sm:$0xff]  }
  0xee   :  { %v343_v28 = vpop.f32.mrf.mxu0 }
  0xef   :  { %v363_v30 = vadd.f32 %v343_v28, %v237_v26  ;;  %v379_v34 = vmax.f32 %v374_v27, 0.0  ;;  %v1976_v26 = vld [vmem:[%s2659_s4 + $0x80] sm:$0xff]  }
  0xf0   :  { %v1768_v31 = vpop.f32.mrf.mxu0 }
  0xf1   :  { %v375_v33 = vadd.f32 %v1533_v23, %v363_v30  ;;  %v414_v41 = vmul.f32 %v392_v29, %v379_v34  ;;  %v1980_v34 = vld [vmem:[%s2662_s9 + $0x38] sm:$0xff]  }
  0xf2   :  { %v348_v35 = vpop.f32.mrf.mxu0 }
  0xf3   :  { %v364_v36 = vadd.f32 %v348_v35, %v242_v32  ;;  %v380_v37 = vmax.f32 %v375_v33, 0.0  ;;  %v1979_v32 = vld [vmem:[%s2661_s6 + $0x74] ss:$8 sps:$4 sm:$0xff]   ;;  %v1977_v33 = vld [vmem:[%s2661_s6 + $0x70] ss:$8 sps:$4 sm:$0xff]  }
  0xf4   :  { %v1771_v39 = vpop.f32.mrf.mxu0  ;;  %956 = vmatprep.subr.bf16.mxu0 %v1979_v32  ;;  %v1983_v35 = vld [vmem:[%s2661_s6 + $0x64] ss:$8 sps:$4 sm:$0xff]  }
  0xf5   :  { %v376_v42 = vadd.f32 %v1533_v23, %v364_v36  ;;  %v415_v43 = vmul.f32 %v397_v38, %v380_v37  ;;  %v1981_v36 = vld [vmem:[%s2661_s6 + $0x60] ss:$8 sps:$4 sm:$0xff]   ;;  %v1984_v37 = vld [vmem:[%s2662_s9 + $0x30] sm:$0xff]  }
  0xf6   :  { %v351_v45 = vpop.f32.mrf.mxu0  ;;  %v1987_v38 = vld [vmem:[%s2661_s6 + $0x54] ss:$8 sps:$4 sm:$0xff]   ;;  %v1985_v39 = vld [vmem:[%s2661_s6 + $0x50] ss:$8 sps:$4 sm:$0xff]  }
  0xf7   :  { %v2318_v46 = vpack.c.bf16 %v415_v43, %v414_v41  ;;  %v365_v47 = vadd.f32 %v351_v45, %v245_v40  ;;  %v381_v50 = vmax.f32 %v376_v42, 0.0  ;;  %v1988_v40 = vld [vmem:[%s2662_s9 + $0x28] sm:$0xff]   ;;  %v1992_v43 = vld [vmem:[%s2662_s9 + $0x20] sm:$0xff]   ;;  %v1993_v45 = vld [vmem:[%s2661_s6 + $0x30] ss:$8 sps:$4 sm:$0xff]  }
  0xf8   :  { %v1772_v48 = vpop.f32.mrf.mxu0  ;;  %v1989_v41 = vld [vmem:[%s2661_s6 + $0x40] ss:$8 sps:$4 sm:$0xff]   ;;  %v1991_v42 = vld [vmem:[%s2661_s6 + $0x44] ss:$8 sps:$4 sm:$0xff]  }
  0xf9   :  { %v377_v51 = vadd.f32 %v1533_v23, %v365_v47  ;;  %1822 = vmatmul.mubr.bf16.vlgmr.msra.gmra.mxu0 %v2318_v46  ;;  %v459_v53 = vshll.u32 %v2318_v46, 16  ;;  %v416_v58 = vmul.f32 %v402_v44, %v381_v50  ;;  %v457_v5 = vshrl.u32 %v2318_v46, 16  ;;  %v1995_v44 = vld [vmem:[%s2661_s6 + $0x34] ss:$8 sps:$4 sm:$0xff]   ;;  %v1999_v47 = vld [vmem:[%s2661_s6 + $0x24] ss:$8 sps:$4 sm:$0xff]  }
  0xfa   :  { %v356_v52 = vpop.f32.mrf.mxu0  ;;  %1825 = vmatprep.mubr.msk.bf16.mxu0 %vm2042_vm0, %v2041_v0  ;;  %v711_v28 = vrot.slane %v2318_v46, 1  ;;  %957 = vmatpush1.bf16.msra.mxu0 %v1977_v33  ;;  %v1996_v46 = vld [vmem:[%s2662_s9 + $0x18] sm:$0xff]   ;;  %v1997_v48 = vld [vmem:[%s2661_s6 + $0x20] ss:$8 sps:$4 sm:$0xff]  }
  0xfb   :  { %v382_v54 = vmax.f32 %v377_v51, 0.0  ;;  %v366_v55 = vadd.f32 %v356_v52, %v250_v49  ;;  %v461_v62 = vrot.slane %v459_v53, 1  ;;  %958 = vmatprep.subr.bf16.mxu0 %v1983_v35  ;;  %v2000_v49 = vld [vmem:[%s2662_s9 + $0x10] sm:$0xff]   ;;  %v2004_v52 = vld [vmem:[%s2662_s9 + $0x8] sm:$0xff]  }
  0xfc   :  { %v1775_v57 = vpop.f32.mrf.mxu0  ;;  %v2003_v50 = vld [vmem:[%s2661_s6 + $0x14] ss:$8 sps:$4 sm:$0xff]   ;;  %v2001_v51 = vld [vmem:[%s2661_s6 + $0x10] ss:$8 sps:$4 sm:$0xff]   ;;  %v2007_v53 = vld [vmem:[%s2661_s6 + $0x4] ss:$8 sps:$4 sm:$0xff]  }
  0xfd   :  { %v417_v59 = vmul.f32 %v407_v56, %v382_v54  ;;  %v378_v60 = vadd.f32 %v1533_v23, %v366_v55  ;;  %v462_v9 = vor.u32 %v461_v62, %v457_v5  ;;  %v2005_v54 = vld [vmem:[%s2661_s6] ss:$8 sps:$4 sm:$0xff]  }
  0xfe   :  { %v359_v61 = vpop.f32.mrf.mxu0  ;;  %959 = vmatpush1.bf16.msra.mxu0 %v1981_v36  ;;  %v2008_v55 = vld [vmem:[%s2662_s9] sm:$0xff]  }
  0xff   :  { %v420_v63 = vpack.c.bf16 %v417_v59, %v416_v58  ;;  %v383_v1 = vmax.f32 %v378_v60, 0.0  ;;  %960 = vmatprep.subr.bf16.mxu0 %v1987_v38 }
 0x100   :  { %v1776_v3 = vpop.f32.mrf.mxu0 }
 0x101   :  { %v464_v6 = vshll.u32 %v420_v63, 16  ;;  %v418_v7 = vmul.f32 %v412_v2, %v383_v1  ;;  %1826 = vmatmul.mubr.bf16.gmra.mxu0 %v420_v63  ;;  %v468_v15 = vshrl.u32 %v420_v63, 16  ;;  %v712_v27 = vrot.slane %v420_v63, 1 }
 0x102   :  { %1829 = vmatprep.mubr.msk.bf16.mxu0 %vm2042_vm0, %v2041_v0  ;;  %961 = vmatpush1.bf16.msra.mxu0 %v1985_v39 }
 0x103   :  { %v421_v8 = vpack.c.bf16 %v418_v7, %v418_v7  ;;  %v466_v10 = vrot.slane %v464_v6, 1  ;;  %v713_v29 = vsel %vm710_vm3, %v711_v28, %v712_v27  ;;  %962 = vmatprep.subr.bf16.mxu0 %v1991_v42 }
 0x105   :  { %v467_v12 = vsel %vm455_vm2, %v462_v9, %v466_v10  ;;  %v472_v13 = vshll.u32 %v421_v8, 16  ;;  %v470_v17 = vor.u32 %v468_v15, %v466_v10  ;;  %v476_v21 = vshrl.u32 %v421_v8, 16 }
 0x106   :  { %1794 = vmatmul.mubr.bf16.vlgmr.msra.gmra.mxu1 %v467_v12  ;;  %v714_v30 = vrot.slane %v421_v8, 1  ;;  %963 = vmatpush1.bf16.msra.mxu0 %v1989_v41 }
 0x107   :  { %1834 = vmatpush3.bf16.msra.mxu1 %v1969_v11  ;;  %1797 = vmatprep.mubr.msk.bf16.mxu1 %vm2042_vm0, %v2041_v0  ;;  %v474_v16 = vrot.slane %v472_v13, 1 }
 0x108   :  { %1835 = vmatprep.subr.bf16.mxu1 %v2041_v0  ;;  %v715_v31 = vsel %vm710_vm3, %v712_v27, %v714_v30  ;;  %964 = vmatprep.subr.bf16.mxu0 %v1995_v44  ;;  %v2010_v44 = vld [vmem:[%s2663_s8 + $0x30] sm:$0xff]  }
 0x109   :  { %1830 = vmatmul.mubr.bf16.gmra.mxu0 %v421_v8  ;;  %v475_v19 = vsel %vm455_vm2, %v470_v17, %v474_v16  ;;  %v478_v23 = vor.u32 %v476_v21, %v474_v16  ;;  %v1590_v21 = vld [vmem:[%s2664_s5] ss:$0 sm:$0xff] }
 0x10a   :  { %988 = vmatprep.mubr.bf16.mxu0 %v2043_v4  ;;  %965 = vmatpush1.bf16.msra.mxu0 %v1993_v45 }
 0x10b   :  { %1836 = vmatpush3.bf16.msra.mxu1 %v1970_v14  ;;  %966 = vmatprep.subr.bf16.mxu0 %v1999_v47 }
 0x10c   :  { %1837 = vmatprep.subr.bf16.mxu1 %v2041_v0 }
 0x10e   :  { %1798 = vmatmul.mubr.bf16.gmra.mxu1 %v475_v19  ;;  %967 = vmatpush1.bf16.msra.mxu0 %v1997_v48 }
 0x10f   :  { %1838 = vmatpush3.bf16.msra.mxu1 %v1971_v18  ;;  %1801 = vmatprep.mubr.msk.bf16.mxu1 %vm2042_vm0, %v2041_v0 }
 0x110   :  { %1839 = vmatprep.subr.bf16.mxu1 %v2041_v0  ;;  %968 = vmatprep.subr.bf16.mxu0 %v2003_v50 }
 0x112   :  { %969 = vmatpush1.bf16.msra.mxu0 %v2001_v51 }
 0x113   :  { %1840 = vmatpush3.bf16.msra.mxu1 %v1972_v20  ;;  %970 = vmatprep.subr.bf16.mxu0 %v2007_v53 }
 0x114   :  { %1841 = vmatprep.subr.bf16.mxu1 %v2041_v0 }
 0x116   :  { %1802 = vmatmul.mubr.bf16.gmra.mxu1 %v478_v23  ;;  %971 = vmatpush1.bf16.msra.mxu0 %v2005_v54 }
 0x117   :  { %1842 = vmatpush3.bf16.msra.mxu1 %v1973_v22  ;;  %1849 = vmatprep.mubr.msk.bf16.mxu1 %vm2042_vm0, %v2041_v0 }
 0x118   :  { %1843 = vmatprep.subr.bf16.mxu1 %v2041_v0  ;;  %1258 = vmatprep.subr.bf16.mxu0 %v2043_v4 }
 0x11b   :  { %1844 = vmatpush3.bf16.msra.mxu1 %v1974_v24 }
 0x11c   :  { %1845 = vmatprep.subr.bf16.mxu1 %v2041_v0 }
 0x11f   :  { %1846 = vmatpush3.bf16.msra.mxu1 %v1975_v25 }
 0x120   :  { %1847 = vmatprep.subr.bf16.mxu1 %v2041_v0 }
 0x123   :  { %1848 = vmatpush3.bf16.msra.mxu1 %v1976_v26 }
 0x124   :  { %1861 = vmatprep.subr.bf16.mxu1 %v2041_v0 }
 0x126   :  { %1850 = vmatmul.mubr.bf16.vlgmr.msra.gmra.mxu1 %v713_v29 }
 0x127   :  { %1853 = vmatprep.mubr.msk.bf16.mxu1 %vm2042_vm0, %v2041_v0  ;;  %1862 = vmatpush3.bf16.msra.mxu1 %v1980_v34 }
 0x128   :  { %1863 = vmatprep.subr.bf16.mxu1 %v2041_v0 }
 0x12b   :  { %1864 = vmatpush3.bf16.msra.mxu1 %v1984_v37  ;;  %v2009_v37 = vld [vmem:[%s2663_s8 + $0x38] sm:$0xff]  }
 0x12c   :  { %1865 = vmatprep.subr.bf16.mxu1 %v2041_v0 }
 0x12e   :  { %1854 = vmatmul.mubr.bf16.gmra.mxu1 %v715_v31 }
 0x12f   :  { %1857 = vmatprep.mubr.msk.bf16.mxu1 %vm2042_vm0, %v2041_v0  ;;  %1866 = vmatpush3.bf16.msra.mxu1 %v1988_v40 }
 0x130   :  { %1867 = vmatprep.subr.bf16.mxu1 %v2041_v0 }
 0x133   :  { %1868 = vmatpush3.bf16.msra.mxu1 %v1992_v43 }
 0x134   :  { %1869 = vmatprep.subr.bf16.mxu1 %v2041_v0 }
 0x136   :  { %1858 = vmatmul.mubr.bf16.gmra.mxu1 %v714_v30 }
 0x137   :  { %1877 = vmatprep.mubr.msk.bf16.mxu1 %vm2042_vm0, %v2041_v0  ;;  %1870 = vmatpush3.bf16.msra.mxu1 %v1996_v46 }
 0x138   :  { %1871 = vmatprep.subr.bf16.mxu1 %v2041_v0 }
 0x13b   :  { %1872 = vmatpush3.bf16.msra.mxu1 %v2000_v49 }
 0x13c   :  { %1873 = vmatprep.subr.bf16.mxu1 %v2041_v0 }
 0x13f   :  { %1874 = vmatpush3.bf16.msra.mxu1 %v2004_v52  ;;  %v2011_v52 = vld [vmem:[%s2663_s8 + $0x28] sm:$0xff]  }
 0x140   :  { %1875 = vmatprep.subr.bf16.mxu1 %v2041_v0 }
 0x143   :  { %1876 = vmatpush3.bf16.msra.mxu1 %v2008_v55 }
 0x144   :  { %1889 = vmatprep.subr.mxu1 %v2041_v0 }
 0x1b9   :  { %v668_v56 = vpop.f32.mrf.mxu0 }
 0x1bb   :  { %v1823_v57 = vpop.f32.mrf.mxu0 }
 0x1bd   :  { %v671_v58 = vpop.f32.mrf.mxu0 }
 0x1bf   :  { %v1824_v59 = vpop.f32.mrf.mxu0 }
 0x1c0   :  { %v2014_v59 = vld [vmem:[%s2663_s8 + $0x10] sm:$0xff]  }
 0x1c1   :  { %v676_v60 = vpop.f32.mrf.mxu0 }
 0x1c3   :  { %v1827_v61 = vpop.f32.mrf.mxu0 }
 0x1c4   :  { %v2016_v61 = vld [vmem:[%s2663_s8] sm:$0xff]  }
 0x1c5   :  { %v679_v62 = vpop.f32.mrf.mxu0 }
 0x1c6   :  { %v564_v63 = vpop.f32.mrf.mxu1 }
 0x1c7   :  { %v1828_v1 = vpop.f32.mrf.mxu0  ;;  %v669_v18 = vadd.f32 %v668_v56, %v564_v63  ;;  %v2012_v56 = vld [vmem:[%s2663_s8 + $0x20] sm:$0xff]   ;;  %v2018_v63 = vld [vmem:[%s2663_s8 + $0x50] sm:$0xff]  }
 0x1c8   :  { %v1795_v2 = vpop.f32.mrf.mxu1  ;;  %v2019_v1 = vld [vmem:[%s2663_s8 + $0x48] sm:$0xff]  }
 0x1c9   :  { %v684_v3 = vpop.f32.mrf.mxu0  ;;  %v2020_v2 = vld [vmem:[%s2663_s8 + $0x40] sm:$0xff]  }
 0x1ca   :  { %v567_v5 = vpop.f32.mrf.mxu1 }
 0x1cb   :  { %v1831_v6 = vpop.f32.mrf.mxu0  ;;  %v672_v23 = vadd.f32 %v671_v58, %v567_v5  ;;  %v2013_v58 = vld [vmem:[%s2663_s8 + $0x18] sm:$0xff]  }
 0x1cc   :  { %v1796_v7 = vpop.f32.mrf.mxu1 }
 0x1cd   :  { %v687_v8 = vpop.f32.mrf.mxu0 }
 0x1ce   :  { %v572_v9 = vpop.f32.mrf.mxu1  ;;  %v864_v8 = vld [vmem:[%s2665_s7] sm:$0x3] }
 0x1cf   :  { %v1832_v10 = vpop.f32.mrf.mxu0  ;;  %v677_v28 = vadd.f32 %v676_v60, %v572_v9  ;;  %v2015_v60 = vld [vmem:[%s2663_s8 + $0x8] sm:$0xff]  }
 0x1d0   :  { %v1799_v11 = vpop.f32.mrf.mxu1 }
 0x1d2   :  { %v575_v12 = vpop.f32.mrf.mxu1 }
 0x1d3   :  { %v680_v35 = vadd.f32 %v679_v62, %v575_v12  ;;  %v2017_v62 = vld [vmem:[%s2663_s8 + $0x58] sm:$0xff]  }
 0x1d4   :  { %v1800_v13 = vpop.f32.mrf.mxu1 }
 0x1d6   :  { %v580_v14 = vpop.f32.mrf.mxu1 }
 0x1d7   :  { %v685_v42 = vadd.f32 %v684_v3, %v580_v14  ;;  %v866_v3 = vlaneseq }
 0x1d8   :  { %v1803_v15 = vpop.f32.mrf.mxu1 }
 0x1d9   :  { %v867_v5 = vshrl.u32 %v866_v3, 7 }
 0x1da   :  { %v583_v16 = vpop.f32.mrf.mxu1 }
 0x1db   :  { %v872_v6 = vsub.s32 1, %v867_v5  ;;  %v868_v7 = vsub.s32 0, %v867_v5  ;;  %v1362_v5 = vld [vmem:[%s2666_s11 + $0x48] sm:$0xff] }
 0x1dc   :  { %v1804_v17 = vpop.f32.mrf.mxu1 }
 0x1dd   :  { %v873_v11 = vrot.slane %v864_v8, %v872_v6  ;;  %v869_v12 = vrot.slane %v864_v8, %v868_v7  ;;  %v1630_v7 = vld [vmem:[%s2667_s10] ss:$0 sm:$0xff] }
 0x1e6   :  { %v801_v19 = vpop.f32.mrf.mxu1 }
 0x1e7   :  { %v823_v20 = vadd.f32 %v801_v19, %v669_v18 }
 0x1e8   :  { %v1851_v22 = vpop.f32.mrf.mxu1 }
 0x1e9   :  { %v835_v25 = vadd.f32 %v1590_v21, %v823_v20 }
 0x1ea   :  { %v804_v24 = vpop.f32.mrf.mxu1 }
 0x1eb   :  { %v824_v26 = vadd.f32 %v804_v24, %v672_v23  ;;  %v840_v31 = vmax.f32 %v835_v25, 0.0 }
 0x1ec   :  { %v1852_v27 = vpop.f32.mrf.mxu1 }
 0x1ed   :  { %v836_v29 = vadd.f32 %v1590_v21, %v824_v26 }
 0x1ee   :  { %v809_v30 = vpop.f32.mrf.mxu1 }
 0x1ef   :  { %v841_v32 = vmax.f32 %v836_v29, 0.0  ;;  %v825_v33 = vadd.f32 %v809_v30, %v677_v28 }
 0x1f0   :  { %v1855_v34 = vpop.f32.mrf.mxu1 }
 0x1f1   :  { %v845_v36 = vpack.c.bf16 %v841_v32, %v840_v31  ;;  %v837_v39 = vadd.f32 %v1590_v21, %v825_v33 }
 0x1f2   :  { %v812_v38 = vpop.f32.mrf.mxu1 }
 0x1f3   :  { %v826_v40 = vadd.f32 %v812_v38, %v680_v35  ;;  %989 = vmatmul.mubr.bf16.vlgmr.msra.gmra.mxu0 %v845_v36  ;;  %1878 = vmatmul.mubr.bf16.vlgmr.msra.gmra.mxu1 %v845_v36  ;;  %v842_v46 = vmax.f32 %v837_v39, 0.0 }
 0x1f4   :  { %v1856_v41 = vpop.f32.mrf.mxu1  ;;  %998 = vmatprep.mubr.bf16.mxu0 %v2043_v4  ;;  %1881 = vmatprep.mubr.msk.bf16.mxu1 %vm2042_vm0, %v2041_v0 }
 0x1f5   :  { %v838_v43 = vadd.f32 %v1590_v21, %v826_v40  ;;  %1259 = vmatpush1.bf16.msra.mxu0 %v2009_v37 }
 0x1f6   :  { %v817_v45 = vpop.f32.mrf.mxu1  ;;  %1260 = vmatprep.subr.bf16.mxu0 %v2043_v4 }
 0x1f7   :  { %v843_v47 = vmax.f32 %v838_v43, 0.0  ;;  %v827_v48 = vadd.f32 %v817_v45, %v685_v42 }
 0x1f8   :  { %v1859_v49 = vpop.f32.mrf.mxu1 }
 0x1f9   :  { %v839_v50 = vadd.f32 %v1590_v21, %v827_v48  ;;  %v846_v51 = vpack.c.bf16 %v843_v47, %v842_v46  ;;  %1261 = vmatpush1.bf16.msra.mxu0 %v2010_v44 }
 0x1fa   :  { %v820_v53 = vpop.f32.mrf.mxu1  ;;  %1262 = vmatprep.subr.bf16.mxu0 %v2043_v4 }
 0x1fb   :  { %999 = vmatmul.mubr.bf16.gmra.mxu0 %v846_v51  ;;  %1882 = vmatmul.mubr.bf16.gmra.mxu1 %v846_v51  ;;  %v844_v55 = vmax.f32 %v839_v50, 0.0 }
 0x1fc   :  { %v1860_v54 = vpop.f32.mrf.mxu1  ;;  %1008 = vmatprep.mubr.bf16.mxu0 %v2043_v4  ;;  %1885 = vmatprep.mubr.msk.bf16.mxu1 %vm2042_vm0, %v2041_v0 }
 0x1fd   :  { %1263 = vmatpush1.bf16.msra.mxu0 %v2011_v52  ;;  %v847_v57 = vpack.c.bf16 %v844_v55, %v844_v55 }
 0x1fe   :  { %1264 = vmatprep.subr.bf16.mxu0 %v2043_v4 }
 0x201   :  { %1265 = vmatpush1.bf16.msra.mxu0 %v2012_v56 }
 0x202   :  { %1266 = vmatprep.subr.bf16.mxu0 %v2043_v4 }
 0x203   :  { %1009 = vmatmul.mubr.bf16.gmra.mxu0 %v847_v57  ;;  %1886 = vmatmul.mubr.bf16.gmra.mxu1 %v847_v57 }
 0x204   :  { %1921 = vmatprep.mubr.msk.f32.mxu1 %vm2042_vm0, %v2041_v0 }
 0x205   :  { %1267 = vmatpush1.bf16.msra.mxu0 %v2013_v58 }
 0x206   :  { %1268 = vmatprep.subr.bf16.mxu0 %v2043_v4 }
 0x209   :  { %1269 = vmatpush1.bf16.msra.mxu0 %v2014_v59 }
 0x20a   :  { %1270 = vmatprep.subr.bf16.mxu0 %v2043_v4 }
 0x20d   :  { %1271 = vmatpush1.bf16.msra.mxu0 %v2015_v60  ;;  %v1368_v60 = vld [vmem:[%s2666_s11 + $0x78] sm:$0xff] }
 0x20e   :  { %1272 = vmatprep.subr.bf16.mxu0 %v2043_v4  ;;  %1890 = vmatpush3.msra.mxu1 %v1368_v60 }
 0x20f   :  { %1891 = vmatprep.subr.mxu1 %v2041_v0 }
 0x211   :  { %1273 = vmatpush1.bf16.msra.mxu0 %v2016_v61  ;;  %v1367_v61 = vld [vmem:[%s2666_s11 + $0x70] sm:$0xff] }
 0x212   :  { %1282 = vmatprep.subr.bf16.mxu0 %v2043_v4  ;;  %1892 = vmatpush3.msra.mxu1 %v1367_v61 }
 0x213   :  { %1893 = vmatprep.subr.mxu1 %v2041_v0 }
 0x215   :  { %1283 = vmatpush2.bf16.msra.mxu0 %v2017_v62  ;;  %v1366_v62 = vld [vmem:[%s2666_s11 + $0x68] sm:$0xff] }
 0x216   :  { %1284 = vmatprep.subr.bf16.mxu0 %v2043_v4  ;;  %1894 = vmatpush3.msra.mxu1 %v1366_v62 }
 0x217   :  { %1895 = vmatprep.subr.mxu1 %v2041_v0 }
 0x219   :  { %1285 = vmatpush2.bf16.msra.mxu0 %v2018_v63  ;;  %v1365_v63 = vld [vmem:[%s2666_s11 + $0x60] sm:$0xff] }
 0x21a   :  { %1286 = vmatprep.subr.bf16.mxu0 %v2043_v4  ;;  %1896 = vmatpush3.msra.mxu1 %v1365_v63  ;;  %v1470_v63 = vand.u32 127, %v866_v3 }
 0x21b   :  { %1897 = vmatprep.subr.mxu1 %v2041_v0 }
 0x21c   :  { %vm1471_vm5 = vcmp.lt.s32.totalorder %v1470_v63, 120 }
 0x21d   :  { %1287 = vmatpush2.bf16.msra.mxu0 %v2019_v1  ;;  %v1364_v1 = vld [vmem:[%s2666_s11 + $0x58] sm:$0xff] }
 0x21e   :  { %1288 = vmatprep.subr.bf16.mxu0 %v2043_v4  ;;  %1898 = vmatpush3.msra.mxu1 %v1364_v1 }
 0x21f   :  { %1899 = vmatprep.subr.mxu1 %v2041_v0 }
 0x221   :  { %1289 = vmatpush2.bf16.msra.mxu0 %v2020_v2  ;;  %v1363_v2 = vld [vmem:[%s2666_s11 + $0x50] sm:$0xff] }
 0x222   :  { %1900 = vmatpush3.msra.mxu1 %v1363_v2 }
 0x223   :  { %1901 = vmatprep.subr.mxu1 %v2041_v0 }
 0x224   :  { %1902 = vmatpush3.msra.mxu1 %v1362_v5 }
 0x225   :  { %1903 = vmatprep.subr.mxu1 %v2041_v0 }
 0x2b3   :  { %v990_v9 = vpop.f32.mrf.mxu0  ;;  %v2518_v10 = vpop.f32.mrf.mxu1 }
 0x2b4   :  { %v991_v18 = vadd.f32 %v990_v9, %v869_v12 }
 0x2b5   :  { %v992_v4 = vpop.f32.mrf.mxu0  ;;  %v1879_v13 = vpop.f32.mrf.mxu1 }
 0x2b6   :  { %v993_v16 = vadd.f32 %v992_v4, %v873_v11  ;;  %v1017_v27 = vmax.f32 %v991_v18, 0.0 }
 0x2b7   :  { %v994_v14 = vpop.f32.mrf.mxu0  ;;  %v2520_v15 = vpop.f32.mrf.mxu1 }
 0x2b8   :  { %v995_v17 = vadd.f32 %v994_v14, %v869_v12  ;;  %v1018_v25 = vmax.f32 %v993_v16, 0.0 }
 0x2b9   :  { %v996_v19 = vpop.f32.mrf.mxu0  ;;  %v1880_v20 = vpop.f32.mrf.mxu1 }
 0x2ba   :  { %v997_v21 = vadd.f32 %v996_v19, %v873_v11  ;;  %v1019_v22 = vmax.f32 %v995_v17, 0.0 }
 0x2bb   :  { %v1000_v23 = vpop.f32.mrf.mxu0  ;;  %v2522_v24 = vpop.f32.mrf.mxu1 }
 0x2bc   :  { %v1020_v26 = vmax.f32 %v997_v21, 0.0  ;;  %v1027_v31 = vpack.c.bf16 %v1019_v22, %v1017_v27  ;;  %v1001_v36 = vadd.f32 %v1000_v23, %v869_v12  ;;  %v1361_v22 = vld [vmem:[%s2666_s11 + $0x40] sm:$0xff] }
 0x2bd   :  { %v1002_v28 = vpop.f32.mrf.mxu0  ;;  %v1883_v29 = vpop.f32.mrf.mxu1  ;;  %1904 = vmatpush3.msra.mxu1 %v1361_v22 }
 0x2be   :  { %v1028_v30 = vpack.c.bf16 %v1020_v26, %v1018_v25  ;;  %v1003_v34 = vadd.f32 %v1002_v28, %v873_v11  ;;  %v1021_v45 = vmax.f32 %v1001_v36, 0.0  ;;  %1905 = vmatprep.subr.mxu1 %v2041_v0  ;;  %v1360_v25 = vld [vmem:[%s2666_s11 + $0x38] sm:$0xff]  ;;  %v1359_v28 = vld [vmem:[%s2666_s11 + $0x30] sm:$0xff]  ;;  %v1354_v36 = vld [vmem:[%s2666_s11 + $0x8] sm:$0xff] }
 0x2bf   :  { %v1004_v32 = vpop.f32.mrf.mxu0  ;;  %v2524_v33 = vpop.f32.mrf.mxu1  ;;  %1906 = vmatpush3.msra.mxu1 %v1360_v25 }
 0x2c0   :  { %v1005_v35 = vadd.f32 %v1004_v32, %v869_v12  ;;  %1627 = vmatprep.mubr.msk.bf16.mxu0 %vm100_vm1, %v1028_v30  ;;  %v1022_v43 = vmax.f32 %v1003_v34, 0.0  ;;  %1907 = vmatprep.subr.mxu1 %v2041_v0  ;;  %v1356_v34 = vld [vmem:[%s2666_s11 + $0x18] sm:$0xff] }
 0x2c1   :  { %v1006_v37 = vpop.f32.mrf.mxu0  ;;  %v1884_v38 = vpop.f32.mrf.mxu1  ;;  %1291 = vmatmul.mubr.bf16.vlgmr.msra.gmra.mxu0 %v1027_v31  ;;  %1908 = vmatpush3.msra.mxu1 %v1359_v28  ;;  %v1358_v31 = vld [vmem:[%s2666_s11 + $0x28] sm:$0xff] }
 0x2c2   :  { %v1007_v39 = vadd.f32 %v1006_v37, %v873_v11  ;;  %v1023_v40 = vmax.f32 %v1005_v35, 0.0  ;;  %1909 = vmatprep.subr.mxu1 %v2041_v0  ;;  %v1355_v35 = vld [vmem:[%s2666_s11 + $0x10] sm:$0xff]  ;;  %v1353_v37 = vld [vmem:[%s2666_s11] sm:$0xff] }
 0x2c3   :  { %v1010_v41 = vpop.f32.mrf.mxu0  ;;  %v2527_v42 = vpop.f32.mrf.mxu1  ;;  %1910 = vmatpush3.msra.mxu1 %v1358_v31 }
 0x2c4   :  { %v1024_v44 = vmax.f32 %v1007_v39, 0.0  ;;  %v1029_v50 = vpack.c.bf16 %v1023_v40, %v1021_v45  ;;  %v1011_v51 = vadd.f32 %v1010_v41, %v869_v12  ;;  %1911 = vmatprep.subr.mxu1 %v2041_v0 }
 0x2c5   :  { %v1012_v46 = vpop.f32.mrf.mxu0  ;;  %v1887_v47 = vpop.f32.mrf.mxu1 }
 0x2c6   :  { %v1030_v48 = vpack.c.bf16 %v1024_v44, %v1022_v43  ;;  %v1013_v49 = vadd.f32 %v1012_v46, %v873_v11  ;;  %v1025_v58 = vmax.f32 %v1011_v51, 0.0 }
 0x2c7   :  { %v1014_v52 = vpop.f32.mrf.mxu0  ;;  %v1174_v53 = vpop.f32.mrf.mxu1 }
 0x2c8   :  { %v1026_v54 = vmax.f32 %v1013_v49, 0.0  ;;  %1628 = vmatprep.mubr.msk.bf16.mxu0 %vm100_vm1, %v1030_v48  ;;  %v1031_v59 = vpack.c.bf16 %v1025_v58, %v1025_v58 }
 0x2c9   :  { %v1015_v55 = vpop.f32.mrf.mxu0  ;;  %v1888_v56 = vpop.f32.mrf.mxu1  ;;  %1299 = vmatmul.mubr.bf16.gmra.mxu0 %v1029_v50 }
 0x2ca   :  { %v1032_v57 = vpack.c.bf16 %v1026_v54, %v1026_v54 }
 0x2cc   :  { %1629 = vmatprep.mubr.msk.bf16.mxu0 %vm100_vm1, %v1032_v57 }
 0x2d1   :  { %1307 = vmatmul.mubr.bf16.gmra.mxu0 %v1031_v59 }
 0x381   :  { %v1292_v6 = vpop.f32.mrf.mxu0 }
 0x382   :  { %v1293_v8 = vadd.f32 %v1292_v6, %v2518_v10 }
 0x383   :  { %v1294_v9 = vpop.f32.mrf.mxu0 }
 0x384   :  { %v2563_v11 = vadd.f32 %v1630_v7, %v1293_v8 }
 0x385   :  { %v1295_v12 = vpop.f32.mrf.mxu0 }
 0x386   :  { %v1296_v4 = vadd.f32 %v1295_v12, %v2520_v15  ;;  %1326 = vmax.xlane.f32.xlu1 %v2563_v11 }
 0x387   :  { %v1297_v13 = vpop.f32.mrf.mxu0 }
 0x388   :  { %v2567_v14 = vadd.f32 %v1630_v7, %v1296_v4 }
 0x389   :  { %v1300_v16 = vpop.f32.mrf.mxu0 }
 0x38a   :  { %v1301_v17 = vadd.f32 %v1300_v16, %v2522_v24  ;;  %1328 = vmax.xlane.f32.xlu0 %v2567_v14 }
 0x38b   :  { %v1302_v18 = vpop.f32.mrf.mxu0 }
 0x38c   :  { %v2571_v19 = vadd.f32 %v1630_v7, %v1301_v17 }
 0x38d   :  { %v1303_v10 = vpop.f32.mrf.mxu0 }
 0x38e   :  { %v1304_v20 = vadd.f32 %v1303_v10, %v2524_v33  ;;  %1330 = vmax.xlane.f32.xlu0 %v2571_v19  ;;  %v1357_v33 = vld [vmem:[%s2666_s11 + $0x20] sm:$0xff] }
 0x38f   :  { %v1305_v21 = vpop.f32.mrf.mxu0  ;;  %1912 = vmatpush3.msra.mxu1 %v1357_v33 }
 0x390   :  { %v2575_v15 = vadd.f32 %v1630_v7, %v1304_v20  ;;  %1913 = vmatprep.subr.mxu1 %v2041_v0 }
 0x391   :  { %v1308_v23 = vpop.f32.mrf.mxu0  ;;  %1914 = vmatpush3.msra.mxu1 %v1356_v34 }
 0x392   :  { %v1309_v24 = vadd.f32 %v1308_v23, %v2527_v42  ;;  %1332 = vmax.xlane.f32.xlu1 %v2575_v15  ;;  %1915 = vmatprep.subr.mxu1 %v2041_v0 }
 0x393   :  { %v1310_v26 = vpop.f32.mrf.mxu0  ;;  %1916 = vmatpush3.msra.mxu1 %v1355_v35 }
 0x394   :  { %v2586_v27 = vadd.f32 %v1630_v7, %v1309_v24  ;;  %1917 = vmatprep.subr.mxu1 %v2041_v0 }
 0x395   :  { %v1311_v29 = vpop.f32.mrf.mxu0  ;;  %1918 = vmatpush3.msra.mxu1 %v1354_v36 }
 0x396   :  { %v1335_v30 = vsel %vm1334_vm4, %v2586_v27, -inf  ;;  %1919 = vmatprep.subr.mxu1 %v2041_v0 }
 0x397   :  { %v1312_v32 = vpop.f32.mrf.mxu0  ;;  %1336 = vmax.xlane.f32.xlu0 %v1335_v30  ;;  %1920 = vmatpush3.msra.mxu1 %v1353_v37 }
 0x40f   :  { %v1327_v38 = vpop.xlane.xlu1 %1326 }
 0x410   :  { %v1338_v39 = vsub.f32 %v2563_v11, %v1327_v38 }
 0x412   :  { %v1343_v40 = vmul.f32 1.442695, %v1338_v39 }
 0x413   :  { %v1329_v41 = vpop.xlane.xlu0 %1328 }
 0x414   :  { %2021 = vpow2.f32 %v1343_v40  ;;  %v1339_v42 = vsub.f32 %v2567_v14, %v1329_v41 }
 0x416   :  { %v1345_v43 = vmul.f32 1.442695, %v1339_v42 }
 0x417   :  { %v1331_v44 = vpop.xlane.xlu0 %1330 }
 0x418   :  { %2023 = vpow2.f32 %v1345_v43  ;;  %v1340_v45 = vsub.f32 %v2571_v19, %v1331_v44 }
 0x41a   :  { %v1347_v46 = vmul.f32 1.442695, %v1340_v45 }
 0x41b   :  { %v1333_v47 = vpop.xlane.xlu1 %1332 }
 0x41c   :  { %2025 = vpow2.f32 %v1347_v46  ;;  %v1341_v48 = vsub.f32 %v2575_v15, %v1333_v47 }
 0x41e   :  { %v1349_v49 = vmul.f32 1.442695, %v1341_v48 }
 0x420   :  { %2027 = vpow2.f32 %v1349_v49  ;;  %v1337_v50 = vpop.xlane.xlu0 %1336 }
 0x421   :  { %v2022_v51 = vpop.eup %2021  ;;  %v1342_v52 = vsub.f32 %v2586_v27, %v1337_v50 }
 0x422   :  { %1922 = vmatmul.mubr.f32.vlgmr.msra.gmra.mxu1 %v2022_v51 }
 0x423   :  { %v1351_v53 = vmul.f32 1.442695, %v1342_v52  ;;  %1924 = vmatprep.mubr.msk.f32.mxu1 %vm2042_vm0, %v2041_v0 }
 0x425   :  { %v2024_v54 = vpop.eup %2023  ;;  %2029 = vpow2.f32 %v1351_v53 }
 0x426   :  { %1925 = vmatmul.mubr.f32.gmra.mxu1 %v2024_v54 }
 0x427   :  { %1927 = vmatprep.mubr.msk.f32.mxu1 %vm2042_vm0, %v2041_v0 }
 0x429   :  { %v2026_v55 = vpop.eup %2025 }
 0x42a   :  { %1928 = vmatmul.mubr.f32.gmra.mxu1 %v2026_v55 }
 0x42b   :  { %1930 = vmatprep.mubr.msk.f32.mxu1 %vm2042_vm0, %v2041_v0 }
 0x42d   :  { %v2028_v56 = vpop.eup %2027 }
 0x42e   :  { %1931 = vmatmul.mubr.f32.gmra.mxu1 %v2028_v56 }
 0x42f   :  { %1933 = vmatprep.mubr.msk.f32.mxu1 %vm2042_vm0, %v2041_v0 }
 0x432   :  { %v2030_v57 = vpop.eup %2029 }
 0x433   :  { %1934 = vmatmul.mubr.f32.gmra.mxu1 %v2030_v57 }
 0x4e2   :  { %v1435_v58 = vpop.f32.mrf.mxu1 }
 0x4e3   :  { %2031 = vrcp.f32 %v1435_v58 }
 0x4e4   :  { %v1923_v59 = vpop.f32.mrf.mxu1 }
 0x4e6   :  { %v1440_v60 = vpop.f32.mrf.mxu1 }
 0x4e7   :  { %2033 = vrcp.f32 %v1440_v60 }
 0x4e8   :  { %v1926_v61 = vpop.f32.mrf.mxu1 }
 0x4ea   :  { %v1445_v62 = vpop.f32.mrf.mxu1 }
 0x4eb   :  { %2035 = vrcp.f32 %v1445_v62 }
 0x4ec   :  { %v1929_v1 = vpop.f32.mrf.mxu1 }
 0x4ee   :  { %v1450_v2 = vpop.f32.mrf.mxu1 }
 0x4ef   :  { %2037 = vrcp.f32 %v1450_v2 }
 0x4f0   :  { %v2032_v5 = vpop.eup %2031  ;;  %v1932_v6 = vpop.f32.mrf.mxu1 }
 0x4f1   :  { %v1464_v7 = vmul.f32 %v2032_v5, %v2022_v51 }
 0x4f3   :  { %v1472_v0 = vsel %vm1471_vm5, %v1464_v7, %v2563_v11  ;;  %v1455_v8 = vpop.f32.mrf.mxu1 }
 0x4f4   :  { %v2034_v9 = vpop.eup %2033  ;;  %1477 = vst [vmem:[%s2668_s12] sm:$0xff] %v1472_v0  ;;  %2039 = vrcp.f32 %v1455_v8 }
 0x4f5   :  { %v1465_v12 = vmul.f32 %v2034_v9, %v2024_v54  ;;  %v1935_v4 = vpop.f32.mrf.mxu1 }
 0x4f7   :  { %v1473_v3 = vsel %vm1471_vm5, %v1465_v12, %v2567_v14 }
 0x4f8   :  { %v2036_v13 = vpop.eup %2035  ;;  %1478 = vst [vmem:[%s2668_s12 + $0x8] sm:$0xff] %v1473_v3 }
 0x4f9   :  { %v1466_v16 = vmul.f32 %v2036_v13, %v2026_v55 }
 0x4fb   :  { %v1474_v11 = vsel %vm1471_vm5, %v1466_v16, %v2571_v19 }
 0x4fc   :  { %v2038_v17 = vpop.eup %2037  ;;  %1479 = vst [vmem:[%s2668_s12 + $0x10] sm:$0xff] %v1474_v11 }
 0x4fd   :  { %v1467_v18 = vmul.f32 %v2038_v17, %v2028_v56 }
 0x4ff   :  { %v1475_v10 = vsel %vm1471_vm5, %v1467_v18, %v2575_v15 }
 0x500   :  { %1480 = vst [vmem:[%s2668_s12 + $0x18] sm:$0xff] %v1475_v10 }
 0x501   :  { %v2040_v14 = vpop.eup %2039 }
 0x502   :  { %v1468_v20 = vmul.f32 %v2040_v14, %v2030_v57 }
 0x504   :  { %v1476_v21 = vsel %vm1471_vm5, %v1468_v20, %v2586_v27 }
 0x505   :  { %1481 = vst [vmem:[%s2668_s12 + $0x20] sm:$0x3f] %v1476_v21 }

</bundles_post_ra>
